<compile_context>
chip_gen: v5e
topology: v5e:2x2
jax: 0.10.0
libtpu: 0.0.40
codegen_flags: <defaults>
</compile_context>

<pallas_src>
import functools
import math

import jax
import jax.numpy as jnp
import numpy as np
from jax.experimental import pallas as pl
from jax.experimental.pallas import tpu as pltpu


# ----------------------------------------------------------------------------
# Pallas kernel 1: FDFP hot path (1x1 conv -> GELU -> 1x1 conv), channels-first
# ----------------------------------------------------------------------------
def _fdfp_kernel(x_ref, w1_ref, b1_ref, w2_ref, b2_ref, o_ref):
    # x_ref : (C, tn)   channels-first, lane-dense column tile
    # w1_ref: (Hc, C)   conv1.weight (out, in);  b1_ref: (Hc, 1)
    # w2_ref: (C, Hc)   conv2.weight (out, in);  b2_ref: (C, 1)
    # o_ref : (C, tn)
    x = x_ref[...]
    h = jnp.dot(w1_ref[...], x, preferred_element_type=jnp.float32) + b1_ref[...]
    # exact (erf) GELU, matching torch.nn.GELU(approximate='none')
    h = 0.5 * h * (1.0 + jax.lax.erf(h * (1.0 / math.sqrt(2.0))))
    o = jnp.dot(w2_ref[...], h, preferred_element_type=jnp.float32) + b2_ref[...]
    o_ref[...] = o.astype(o_ref.dtype)


def _fdfp_tile_cols(n_cols, c, hc, target_block_bytes=4 << 20):
    """Column tile: as big as a few-MB VMEM budget allows (multiple of 128),
    capped so the grid keeps >= 2 steps (both v7x TensorCores get work)."""
    # bytes per column: double-buffered in/out blocks + f32 (Hc, tn) intermediate
    per_col_bytes = (2 * 2 * c + hc) * 4
    tn = max(256, (target_block_bytes // per_col_bytes) // 128 * 128)
    half = -(-n_cols // 2)                     # ceil(n/2)
    half = max(128, -(-half // 128) * 128)     # round up to lane multiple
    return int(min(tn, half))


def fdfp_forward(x, p):
    """FDFP effective forward: per-pixel channel MLP.  x: (B,H,W,C) -> same."""
    B, H, W, C = x.shape
    Hc = p["w1"].shape[0]
    n = B * H * W

    # channels-first so the large pixel dimension sits on the 128-lane axis
    xt = x.reshape(n, C).T                                    # (C, n)

    tn = _fdfp_tile_cols(n, C, Hc)
    n_pad = -(-n // tn) * tn
    if n_pad != n:                                            # pad, never collapse grid
        xt = jnp.pad(xt, ((0, 0), (0, n_pad - n)))

    cost = pl.CostEstimate(
        flops=4 * n_pad * C * Hc,
        transcendentals=n_pad * Hc,
        bytes_accessed=(2 * n_pad * C + 2 * C * Hc + Hc + C) * 4,
    )

    out_t = pl.pallas_call(
        _fdfp_kernel,
        out_shape=jax.ShapeDtypeStruct((C, n_pad), jnp.float32),
        grid_spec=pltpu.PrefetchScalarGridSpec(
            num_scalar_prefetch=0,
            grid=(n_pad // tn,),
            in_specs=[
                pl.BlockSpec((C, tn), lambda i: (0, i)),
                pl.BlockSpec((Hc, C), lambda i: (0, 0)),
                pl.BlockSpec((Hc, 1), lambda i: (0, 0)),
                pl.BlockSpec((C, Hc), lambda i: (0, 0)),
                pl.BlockSpec((C, 1), lambda i: (0, 0)),
            ],
            out_specs=pl.BlockSpec((C, tn), lambda i: (0, i)),
        ),
        compiler_params=pltpu.CompilerParams(
            dimension_semantics=("parallel",),
            vmem_limit_bytes=48 * 1024 * 1024,
        ),
        cost_estimate=cost,
    )(xt, p["w1"], p["b1"].reshape(Hc, 1), p["w2"], p["b2"].reshape(C, 1))

    return out_t[:, :n].T.reshape(B, H, W, C)


def _fdfp_ref(x, p):
    h = jnp.einsum("bhwc,oc->bhwo", x, p["w1"],
                   precision=jax.lax.Precision.HIGHEST) + p["b1"]
    h = 0.5 * h * (1.0 + jax.lax.erf(h * (1.0 / math.sqrt(2.0))))
    return jnp.einsum("bhwo,co->bhwc", h, p["w2"],
                      precision=jax.lax.Precision.HIGHEST) + p["b2"]


# ----------------------------------------------------------------------------
# Pallas kernel 2: WindowAttention_Sparse core (one window per grid step)
# ----------------------------------------------------------------------------
def _win_attn_kernel(q_ref, k_ref, v_ref, bias_ref, mask_ref, w_ref, o_ref):
    # q/k/v : (nH, N, D)  one window, all heads (q already scaled)
    # bias  : (nH, N, N)  relative position bias
    # mask  : (N, N)      additive shift mask for this window (zeros if none)
    # w     : (2,) f32 in SMEM: softmax-normalized blend weights (w0, w1)
    q = q_ref[...]
    k = k_ref[...]
    v = v_ref[...]
    s = jnp.einsum("hnd,hmd->hnm", q, k, preferred_element_type=jnp.float32)
    s = s + bias_ref[...] + mask_ref[...][None, :, :]
    m = jnp.max(s, axis=-1, keepdims=True)
    e = jnp.exp(s - m)
    attn0 = e / jnp.sum(e, axis=-1, keepdims=True)        # softmax branch
    r = jnp.maximum(s, 0.0)
    attn1 = r * r                                          # relu^2 branch
    a = attn0 * w_ref[0] + attn1 * w_ref[1]
    o = jnp.einsum("hnm,hmd->hnd", a, v, preferred_element_type=jnp.float32)
    o_ref[...] = o.astype(o_ref.dtype)


def _win_attn_pallas(q, k, v, bias, mask, w12):
    B_, nH, N, D = q.shape
    n_mask = mask.shape[0]
    qkv_spec = pl.BlockSpec((None, nH, N, D), lambda b: (b, 0, 0, 0))
    return pl.pallas_call(
        _win_attn_kernel,
        out_shape=jax.ShapeDtypeStruct((B_, nH, N, D), jnp.float32),
        grid_spec=pltpu.PrefetchScalarGridSpec(
            num_scalar_prefetch=0,
            grid=(B_,),
            in_specs=[
                qkv_spec,
                pl.BlockSpec((None, nH, N, D), lambda b: (b, 0, 0, 0)),
                pl.BlockSpec((None, nH, N, D), lambda b: (b, 0, 0, 0)),
                pl.BlockSpec((nH, N, N), lambda b: (0, 0, 0)),
                pl.BlockSpec((None, N, N), lambda b: (b % n_mask, 0, 0)),
                pl.BlockSpec(memory_space=pltpu.MemorySpace.SMEM),
            ],
            out_specs=pl.BlockSpec((None, nH, N, D), lambda b: (b, 0, 0, 0)),
        ),
        compiler_params=pltpu.CompilerParams(
            dimension_semantics=("parallel",),
        ),
    )(q, k, v, bias, mask, w12)


def _win_attn_ref(q, k, v, bias, mask, w12):
    B_ = q.shape[0]
    n_mask = mask.shape[0]
    s = jnp.einsum("bhnd,bhmd->bhnm", q, k, precision=jax.lax.Precision.HIGHEST)
    s = s + bias[None] + jnp.tile(mask, (B_ // n_mask, 1, 1))[:, None, :, :]
    m = jnp.max(s, axis=-1, keepdims=True)
    e = jnp.exp(s - m)
    attn0 = e / jnp.sum(e, axis=-1, keepdims=True)
    attn1 = jnp.maximum(s, 0.0) ** 2
    a = attn0 * w12[0] + attn1 * w12[1]
    return jnp.einsum("bhnm,bhmd->bhnd", a, v, precision=jax.lax.Precision.HIGHEST)


# ----------------------------------------------------------------------------
# JAX glue: WindowAttention_Sparse / window reshuffles / shift mask / LayerNorm
# ----------------------------------------------------------------------------
@functools.lru_cache(maxsize=None)
def _relative_position_index(win_size):
    coords = np.stack(np.meshgrid(np.arange(win_size), np.arange(win_size),
                                  indexing="ij"))
    flat = coords.reshape(2, -1)
    rel = (flat[:, :, None] - flat[:, None, :]).transpose(1, 2, 0).astype(np.int64)
    rel[:, :, 0] += win_size - 1
    rel[:, :, 1] += win_size - 1
    rel[:, :, 0] *= 2 * win_size - 1
    return rel.sum(-1)                                        # (N, N)


def window_attention_sparse(x, p, *, num_heads, win_size, attn_kv=None,
                            mask=None, use_pallas=True):
    """Port of WindowAttention_Sparse.forward (dropout = identity, ratio = 1)."""
    B_, N, C = x.shape
    nH = num_heads
    D = C // nH
    scale = D ** -0.5

    # LinearProjection
    q = x @ p["to_q_w"].T + p["to_q_b"]
    if attn_kv is None:
        kv = x @ p["to_kv_from_q_w"].T + p["to_kv_from_q_b"]
    else:
        kv = attn_kv @ p["to_kv_w"].T + p["to_kv_b"]
    q = q.reshape(B_, N, nH, D).transpose(0, 2, 1, 3) * scale     # (B_, nH, N, D)
    kv = kv.reshape(B_, N, 2, nH, D).transpose(2, 0, 3, 1, 4)
    k, v = kv[0], kv[1]

    idx = _relative_position_index(win_size).reshape(-1)
    bias = p["rpb_table"][idx].reshape(N, N, nH).transpose(2, 0, 1)  # (nH, N, N)

    if mask is None:
        mask = jnp.zeros((1, N, N), jnp.float32)
    w12 = jax.nn.softmax(p["w"]).astype(jnp.float32)              # exp(w)/sum(exp(w))

    if use_pallas:
        o = _win_attn_pallas(q, k, v, bias, mask, w12)
    else:
        o = _win_attn_ref(q, k, v, bias, mask, w12)

    o = o.transpose(0, 2, 1, 3).reshape(B_, N, C)
    return o @ p["proj_w"].T + p["proj_b"]


def window_partition(x, ws):
    B, H, W, C = x.shape
    x = x.reshape(B, H // ws, ws, W // ws, ws, C)
    return x.transpose(0, 1, 3, 2, 4, 5).reshape(-1, ws, ws, C)


def window_reverse(windows, ws, H, W):
    B = windows.shape[0] // ((H // ws) * (W // ws))
    x = windows.reshape(B, H // ws, W // ws, ws, ws, -1)
    return x.transpose(0, 1, 3, 2, 4, 5).reshape(B, H, W, -1)


def _build_shift_attn_mask(H, W, ws, shift):
    img = np.zeros((1, H, W, 1), np.float32)
    cnt = 0
    slices = (slice(0, -ws), slice(-ws, -shift), slice(-shift, None))
    for hs in slices:
        for wsl in slices:
            img[:, hs, wsl, :] = cnt
            cnt += 1
    mw = img.reshape(1, H // ws, ws, W // ws, ws, 1)
    mw = mw.transpose(0, 1, 3, 2, 4, 5).reshape(-1, ws * ws)       # (nW, N)
    diff = mw[:, None, :] - mw[:, :, None]                          # (nW, N, N)
    return jnp.asarray(np.where(diff != 0, -100.0, 0.0).astype(np.float32))


def _layer_norm(x, gamma, beta, eps=1e-5):
    mu = jnp.mean(x, axis=-1, keepdims=True)
    var = jnp.mean((x - mu) ** 2, axis=-1, keepdims=True)
    return (x - mu) * jax.lax.rsqrt(var + eps) * gamma + beta


# ----------------------------------------------------------------------------
# MDASSA forward
# ----------------------------------------------------------------------------
def mdassa_forward(x, params, *, num_heads, win_size, shift_size, use_pallas=True):
    """Port of MDASSA.forward(x, mask=None).  x: (B, L, C) -> (B, H, W, C)."""
    B, L, C = x.shape
    H = W = int(math.sqrt(L))
    N = win_size * win_size

    attn_mask = (_build_shift_attn_mask(H, W, win_size, shift_size)
                 if shift_size > 0 else None)

    x = _layer_norm(x, params["norm1_g"], params["norm1_b"])
    shortcut = x
    x = x.reshape(B, H, W, C)
    freq_in = x

    # ---- spatial window attention branch ------------------------------------
    shifted_x = (jnp.roll(x, (-shift_size, -shift_size), axis=(1, 2))
                 if shift_size > 0 else x)
    x_windows = window_partition(shifted_x, win_size).reshape(-1, N, C)
    attn_windows = window_attention_sparse(
        x_windows, params["attn"], num_heads=num_heads, win_size=win_size,
        attn_kv=None, mask=attn_mask, use_pallas=use_pallas)
    attn_windows = attn_windows.reshape(-1, win_size, win_size, C)
    shifted_x = window_reverse(attn_windows, win_size, H, W)
    x = (jnp.roll(shifted_x, (shift_size, shift_size), axis=(1, 2))
         if shift_size > 0 else shifted_x)
    x = shortcut + x.reshape(B, H * W, C)            # spatial_drop_path = Identity
    x_spatial = x.reshape(B, H, W, C)

    # ---- frequency branch ----------------------------------------------------
    freq_q = (fdfp_forward(freq_in, params["fdfp"]) if use_pallas
              else _fdfp_ref(freq_in, params["fdfp"]))
    freq_shortcut = freq_q

    # conv1x1 (1x1 conv == per-pixel matmul) then split into k, v
    kv = jnp.einsum("bhwc,oc->bhwo", x_spatial, params["conv1x1_w"]) \
        + params["conv1x1_b"]
    k, v = jnp.split(kv, 2, axis=3)

    if shift_size > 0:
        freq_q_s = jnp.roll(freq_q, (-shift_size, -shift_size), axis=(1, 2))
        k = jnp.roll(k, (-shift_size, -shift_size), axis=(1, 2))
        v = jnp.roll(v, (-shift_size, -shift_size), axis=(1, 2))
    else:
        freq_q_s = freq_q

    qw = window_partition(freq_q_s, win_size).reshape(-1, N, C)
    kw = window_partition(k, win_size)
    vw = window_partition(v, win_size)
    kvw = jnp.concatenate([kw, vw], axis=-1).reshape(-1, N, 2 * C)

    freq_attn_windows = window_attention_sparse(
        qw, params["freq_attn"], num_heads=num_heads, win_size=win_size,
        attn_kv=kvw, mask=None, use_pallas=use_pallas)
    freq_attn_windows = freq_attn_windows.reshape(-1, win_size, win_size, C)
    shifted_freq = window_reverse(freq_attn_windows, win_size, H, W)
    freq_attn = (jnp.roll(shifted_freq, (shift_size, shift_size), axis=(1, 2))
                 if shift_size > 0 else shifted_freq)
    return freq_shortcut + freq_attn                 # freq_drop_path = Identity


# ----------------------------------------------------------------------------
# Parameter init (deterministic, Conv2d/Linear-style bounds)
# ----------------------------------------------------------------------------
def _linear_init(key, out_f, in_f):
    bound = 1.0 / math.sqrt(in_f)
    kw, kb = jax.random.split(key)
    w = jax.random.uniform(kw, (out_f, in_f), minval=-bound, maxval=bound,
                           dtype=jnp.float32)
    b = jax.random.uniform(kb, (out_f,), minval=-bound, maxval=bound,
                           dtype=jnp.float32)
    return w, b


def _attn_init(key, dim, num_heads, win_size):
    k1, k2, k3, k4, k5, k6 = jax.random.split(key, 6)
    to_q_w, to_q_b = _linear_init(k1, dim, dim)
    to_kv_from_q_w, to_kv_from_q_b = _linear_init(k2, 2 * dim, dim)
    to_kv_w, to_kv_b = _linear_init(k3, 2 * dim, 2 * dim)
    proj_w, proj_b = _linear_init(k4, dim, dim)
    rpb_table = 0.02 * jax.random.normal(
        k5, ((2 * win_size - 1) ** 2, num_heads), dtype=jnp.float32)
    w = jnp.ones((2,), jnp.float32) + 0.1 * jax.random.normal(
        k6, (2,), dtype=jnp.float32)
    return dict(to_q_w=to_q_w, to_q_b=to_q_b,
                to_kv_from_q_w=to_kv_from_q_w, to_kv_from_q_b=to_kv_from_q_b,
                to_kv_w=to_kv_w, to_kv_b=to_kv_b,
                proj_w=proj_w, proj_b=proj_b, rpb_table=rpb_table, w=w)


def init_mdassa_params(key, dim, num_heads, win_size):
    hidden = 2 * dim
    k1, k2, k3, k4, k5 = jax.random.split(key, 5)
    w1, b1 = _linear_init(k3, hidden, dim)        # fdfp.conv1 (1x1)
    w2, b2 = _linear_init(k4, dim, hidden)        # fdfp.conv2 (1x1)
    cw, cb = _linear_init(k5, 2 * dim, dim)       # conv1x1
    return dict(
        norm1_g=jnp.ones((dim,), jnp.float32),
        norm1_b=jnp.zeros((dim,), jnp.float32),
        attn=_attn_init(k1, dim, num_heads, win_size),
        freq_attn=_attn_init(k2, dim, num_heads, win_size),
        fdfp=dict(w1=w1, b1=b1, w2=w2, b2=b2),
        conv1x1_w=cw, conv1x1_b=cb,
    )


if __name__ == "__main__":
    B, H, W = 2, 16, 16
    dim, num_heads, win_size = 32, 4, 8

    key = jax.random.PRNGKey(0)
    kx, kp = jax.random.split(key)
    x = jax.random.normal(kx, (B, H * W, dim), dtype=jnp.float32)
    params = init_mdassa_params(kp, dim, num_heads, win_size)

    for shift_size in (0, win_size // 2):
        out = mdassa_forward(x, params, num_heads=num_heads, win_size=win_size,
                             shift_size=shift_size, use_pallas=True)
        out = jax.block_until_ready(out)
        ref = mdassa_forward(x, params, num_heads=num_heads, win_size=win_size,
                             shift_size=shift_size, use_pallas=False)
        assert out.shape == (B, H, W, dim)
        assert jnp.allclose(out, ref, atol=1e-3, rtol=1e-3), \
            f"mismatch vs reference (shift_size={shift_size})"

    print("KERNEL_OK")
</pallas_src>

<mosaic_0001>
module attributes {stable_mosaic.version = 11 : i64} {
  func.func @_win_attn_kernel(%arg0: i32, %arg1: memref<1x4x64x8xf32, #tpu.memory_space<vmem>>, %arg2: memref<1x4x64x8xf32, #tpu.memory_space<vmem>>, %arg3: memref<1x4x64x8xf32, #tpu.memory_space<vmem>>, %arg4: memref<4x64x64xf32, #tpu.memory_space<vmem>>, %arg5: memref<1x64x64xf32, #tpu.memory_space<vmem>>, %arg6: memref<2xf32, #tpu.memory_space<smem>>, %arg7: memref<1x4x64x8xf32, #tpu.memory_space<vmem>>) attributes {dimension_semantics = [#tpu.dimension_semantics<parallel>], iteration_bounds = array<i64: 8>, scalar_prefetch = 0 : i64, scratch_operands = 0 : i64, tpu.core_type = #tpu.core_type<tc>, window_params = [{transform_indices = @transform_0, window_bounds = array<i64: 1, 4, 64, 8>}, {transform_indices = @transform_1, window_bounds = array<i64: 1, 4, 64, 8>}, {transform_indices = @transform_2, window_bounds = array<i64: 1, 4, 64, 8>}, {pipeline_mode = #tpu.pipeline_mode<synchronous>, transform_indices = @transform_3, window_bounds = array<i64: 4, 64, 64>}, {transform_indices = @transform_4, window_bounds = array<i64: 1, 64, 64>}, {transform_indices = @transform_5, window_bounds = array<i64: 2>}, {transform_indices = @transform_6, window_bounds = array<i64: 1, 4, 64, 8>}]} {
    %c0 = arith.constant 0 : index
    %c0_0 = arith.constant 0 : index
    %c0_1 = arith.constant 0 : index
    %c0_2 = arith.constant 0 : index
    %0 = vector.load %arg1[%c0, %c0_0, %c0_1, %c0_2] : memref<1x4x64x8xf32, #tpu.memory_space<vmem>>, vector<1x4x64x8xf32>
    %1 = vector.shape_cast %0 : vector<1x4x64x8xf32> to vector<4x64x8xf32>
    %c0_3 = arith.constant 0 : index
    %c0_4 = arith.constant 0 : index
    %c0_5 = arith.constant 0 : index
    %c0_6 = arith.constant 0 : index
    %2 = vector.load %arg2[%c0_3, %c0_4, %c0_5, %c0_6] : memref<1x4x64x8xf32, #tpu.memory_space<vmem>>, vector<1x4x64x8xf32>
    %3 = vector.shape_cast %2 : vector<1x4x64x8xf32> to vector<4x64x8xf32>
    %c0_7 = arith.constant 0 : index
    %c0_8 = arith.constant 0 : index
    %c0_9 = arith.constant 0 : index
    %c0_10 = arith.constant 0 : index
    %4 = vector.load %arg3[%c0_7, %c0_8, %c0_9, %c0_10] : memref<1x4x64x8xf32, #tpu.memory_space<vmem>>, vector<1x4x64x8xf32>
    %5 = vector.shape_cast %4 : vector<1x4x64x8xf32> to vector<4x64x8xf32>
    "tpu.trace_start"() <{level = 10 : i32, message = "hnd,hmd->hnm"}> : () -> ()
    %cst = arith.constant dense<0.000000e+00> : vector<4x64x64xf32>
    %6 = tpu.matmul %1, %3, %cst {dimension_numbers = #tpu.dot_dimension_numbers<[2], [2], [1], [1], [0, 0, 0, 1, 1, 1], [0], [0]>} : vector<4x64x8xf32>, vector<4x64x8xf32>, vector<4x64x64xf32> -> vector<4x64x64xf32>
    "tpu.trace_stop"() : () -> ()
    %c0_11 = arith.constant 0 : index
    %c0_12 = arith.constant 0 : index
    %c0_13 = arith.constant 0 : index
    %7 = vector.load %arg4[%c0_11, %c0_12, %c0_13] : memref<4x64x64xf32, #tpu.memory_space<vmem>>, vector<4x64x64xf32>
    %8 = arith.addf %6, %7 : vector<4x64x64xf32>
    %c0_14 = arith.constant 0 : index
    %c0_15 = arith.constant 0 : index
    %c0_16 = arith.constant 0 : index
    %9 = vector.load %arg5[%c0_14, %c0_15, %c0_16] : memref<1x64x64xf32, #tpu.memory_space<vmem>>, vector<1x64x64xf32>
    %10 = vector.shape_cast %9 : vector<1x64x64xf32> to vector<64x64xf32>
    %11 = vector.shape_cast %10 : vector<64x64xf32> to vector<1x64x64xf32>
    %12 = vector.broadcast %11 : vector<1x64x64xf32> to vector<4x64x64xf32>
    %13 = arith.addf %8, %12 : vector<4x64x64xf32>
    %cst_17 = arith.constant dense<0xFF800000> : vector<4x64xf32>
    %14 = vector.multi_reduction <maximumf>, %13, %cst_17 [2] : vector<4x64x64xf32> to vector<4x64xf32>
    %15 = vector.shape_cast %14 : vector<4x64xf32> to vector<4x64x1xf32>
    %16 = vector.broadcast %15 : vector<4x64x1xf32> to vector<4x64x64xf32>
    %17 = arith.subf %13, %16 : vector<4x64x64xf32>
    %18 = math.exp %17 : vector<4x64x64xf32>
    %cst_18 = arith.constant dense<0.000000e+00> : vector<4x64xf32>
    %19 = vector.multi_reduction <add>, %18, %cst_18 [2] : vector<4x64x64xf32> to vector<4x64xf32>
    %20 = vector.shape_cast %19 : vector<4x64xf32> to vector<4x64x1xf32>
    %21 = vector.broadcast %20 : vector<4x64x1xf32> to vector<4x64x64xf32>
    %22 = arith.divf %18, %21 : vector<4x64x64xf32>
    %cst_19 = arith.constant 0.000000e+00 : f32
    %23 = vector.broadcast %cst_19 : f32 to vector<4x64x64xf32>
    %24 = arith.maximumf %13, %23 : vector<4x64x64xf32>
    %25 = arith.mulf %24, %24 : vector<4x64x64xf32>
    %c0_20 = arith.constant 0 : index
    %26 = memref.load %arg6[%c0_20] : memref<2xf32, #tpu.memory_space<smem>>
    %27 = vector.broadcast %26 : f32 to vector<4x64x64xf32>
    %28 = arith.mulf %22, %27 : vector<4x64x64xf32>
    %c1 = arith.constant 1 : index
    %29 = memref.load %arg6[%c1] : memref<2xf32, #tpu.memory_space<smem>>
    %30 = vector.broadcast %29 : f32 to vector<4x64x64xf32>
    %31 = arith.mulf %25, %30 : vector<4x64x64xf32>
    %32 = arith.addf %28, %31 : vector<4x64x64xf32>
    "tpu.trace_start"() <{level = 10 : i32, message = "hnm,hmd->hnd"}> : () -> ()
    %cst_21 = arith.constant dense<0.000000e+00> : vector<4x64x8xf32>
    %33 = tpu.matmul %32, %5, %cst_21 {dimension_numbers = #tpu.dot_dimension_numbers<[2], [1], [1], [2], [0, 0, 0, 1, 1, 2], [0], [0]>} : vector<4x64x64xf32>, vector<4x64x8xf32>, vector<4x64x8xf32> -> vector<4x64x8xf32>
    "tpu.trace_stop"() : () -> ()
    %c0_22 = arith.constant 0 : index
    %c0_23 = arith.constant 0 : index
    %c0_24 = arith.constant 0 : index
    %c0_25 = arith.constant 0 : index
    %34 = vector.load %arg7[%c0_22, %c0_23, %c0_24, %c0_25] : memref<1x4x64x8xf32, #tpu.memory_space<vmem>>, vector<1x4x64x8xf32>
    %35 = vector.shape_cast %34 : vector<1x4x64x8xf32> to vector<4x64x8xf32>
    %36 = vector.shape_cast %33 : vector<4x64x8xf32> to vector<1x4x64x8xf32>
    tpu.vector_store %arg7[%c0_22, %c0_23, %c0_24, %c0_25], %36 {strides = array<i32>} : memref<1x4x64x8xf32, #tpu.memory_space<vmem>>, vector<1x4x64x8xf32>,
    return
  }
  func.func @transform_0(%arg0: i32) -> (i32, i32, i32, i32) {
    %c0_i32 = arith.constant 0 : i32
    %c0_i32_0 = arith.constant 0 : i32
    %c0_i32_1 = arith.constant 0 : i32
    %c0_i32_2 = arith.constant 0 : i32
    return %arg0, %c0_i32, %c0_i32_0, %c0_i32_1 : i32, i32, i32, i32
  }
  func.func @transform_1(%arg0: i32) -> (i32, i32, i32, i32) {
    %c0_i32 = arith.constant 0 : i32
    %c0_i32_0 = arith.constant 0 : i32
    %c0_i32_1 = arith.constant 0 : i32
    %c0_i32_2 = arith.constant 0 : i32
    return %arg0, %c0_i32, %c0_i32_0, %c0_i32_1 : i32, i32, i32, i32
  }
  func.func @transform_2(%arg0: i32) -> (i32, i32, i32, i32) {
    %c0_i32 = arith.constant 0 : i32
    %c0_i32_0 = arith.constant 0 : i32
    %c0_i32_1 = arith.constant 0 : i32
    %c0_i32_2 = arith.constant 0 : i32
    return %arg0, %c0_i32, %c0_i32_0, %c0_i32_1 : i32, i32, i32, i32
  }
  func.func @transform_3(%arg0: i32) -> (i32, i32, i32) {
    %c0_i32 = arith.constant 0 : i32
    %c0_i32_0 = arith.constant 0 : i32
    %c0_i32_1 = arith.constant 0 : i32
    %c0_i32_2 = arith.constant 0 : i32
    return %c0_i32, %c0_i32_0, %c0_i32_1 : i32, i32, i32
  }
  func.func @transform_4(%arg0: i32) -> (i32, i32, i32) {
    %c1_i32 = arith.constant 1 : i32
    %c0_i32 = arith.constant 0 : i32
    %0 = arith.cmpi eq, %c1_i32, %c0_i32 : i32
    %c1_i32_0 = arith.constant 1 : i32
    %1 = arith.select %0, %c1_i32_0, %c1_i32 : i32
    %2 = arith.remsi %arg0, %1 : i32
    %c0_i32_1 = arith.constant 0 : i32
    %3 = arith.cmpi ne, %2, %c0_i32_1 : i32
    %c0_i32_2 = arith.constant 0 : i32
    %4 = arith.cmpi slt, %2, %c0_i32_2 : i32
    %c0_i32_3 = arith.constant 0 : i32
    %5 = arith.cmpi slt, %1, %c0_i32_3 : i32
    %6 = arith.xori %4, %5 : i1
    %7 = arith.andi %6, %3 : i1
    %8 = arith.addi %2, %1 : i32
    %9 = arith.select %7, %8, %2 : i32
    %c0_i32_4 = arith.constant 0 : i32
    %c0_i32_5 = arith.constant 0 : i32
    %c0_i32_6 = arith.constant 0 : i32
    return %9, %c0_i32_4, %c0_i32_5 : i32, i32, i32
  }
  func.func @transform_5(%arg0: i32) -> i32 {
    %c0_i32 = arith.constant 0 : i32
    %c0_i32_0 = arith.constant 0 : i32
    return %c0_i32 : i32
  }
  func.func @transform_6(%arg0: i32) -> (i32, i32, i32, i32) {
    %c0_i32 = arith.constant 0 : i32
    %c0_i32_0 = arith.constant 0 : i32
    %c0_i32_1 = arith.constant 0 : i32
    %c0_i32_2 = arith.constant 0 : i32
    return %arg0, %c0_i32, %c0_i32_0, %c0_i32_1 : i32, i32, i32, i32
  }
}

</mosaic_0001>

<bundles_post_ra>
// kernel: tpu_custom_call.1
= control target key start
LH: loop header
LB: loop body
LE: loop exit
PB: predicated region body
PF: predicated region fallthrough
CT: control target
= control target key end

     0   :  { %11 = vsyncpa [#allocation3], 0  ;;  %s2475_s21 = smov 0   ;;  %s4387_s0 = inlined_call_operand.vmem [shape: f32[8,4,64,8], index: 0, kind: input, shape index: {}]   ;;  %s4388_s1 = inlined_call_operand.vmem [shape: f32[8,4,64,8], index: 1, kind: input, shape index: {}]   ;;  %s4389_s2 = inlined_call_operand.vmem [shape: f32[8,4,64,8], index: 2, kind: input, shape index: {}]   ;;  %s4390_s3 = inlined_call_operand.vmem [shape: f32[4,64,64], index: 3, kind: input, shape index: {}]   ;;  %s4391_s4 = inlined_call_operand.vmem [shape: f32[1,64,64], index: 4, kind: input, shape index: {}]   ;;  %s4392_s5 = inlined_call_operand.vmem [shape: f32[2], index: 5, kind: input, shape index: {}]   ;;  %s4393_s6 = inlined_call_operand.vmem [shape: f32[8,4,64,8], index: 6, kind: output, shape index: {}]  }
   0x1 LB: > { %s2147_s22 = sadd.s32 4294967295, %s2437_s21   ;;  %p2149_p0 = scmp.ge.s32.totalorder %s2437_s21, 1  ;;  %s2437_s21 = sphi %s2475_s21, %s17_s21  }
   0x2   : > { %p189_p1 = scmp.lt.s32.totalorder %s2437_s21, 9  ;;  %s207_s25 = sshll.u32 %s4392_s5, 4  ;;  %s208_s25 = int_to_ptr.vmem [resolvable:$true] %s207_s25 }
   0x3   : > { %p2273_p3 = scmp.eq.s32.totalorder %s2147_s22, 0  ;;  %s2439_s26 = smov [#allocation2]  }
   0x4   : > { %p190_p2 = pnand %p2149_p0, %p189_p1 }
   0x6   : > { %p2269_p4 = pneg %p190_p2  ;;  %244 = sbr.rel (%p190_p2) target bundleno = 719 (0x2cf), region = 44 }
   0x8   : > { %p2270_p5 = pnand %p2273_p3, %p2269_p4 }
   0xa   : > { %2272 = dma.vmem_to_smem (!%p2270_p5), %s208_s25, 16, %s2439_s26, [#allocation3]  }
   0xb   : > { %2432 = dma.done.wait (%p2273_p3), [#allocation3], 16  }
   0xc   : > { %2434 = vsyncadd (%p2273_p3), [#allocation3], 4294967280 }
   0xd   : > { %251 = sfence }
   0xe   : > { %p286_p6 = scmp.lt.s32.totalorder %s2147_s22, 7  ;;  %vm4417_vm0 = vcmask 64512   ;;  %vm4418_vm1 = vcmask 523264   ;;  %s2226_s29 = sld [smem:[#allocation2 + $0x1]] }
  0x10   : > { %s4653_s22 = smov (!%p286_p6, %s2147_s22), 7 }
  0x11   : > { %s2486_s27 = sshll.u32 %s4653_s22, 8 }
  0x12   : > { %s2492_s30 = scalar_lea.vmem %s4388_s1, %s2486_s27  ;;  %s2555_s9 = scalar_lea.vmem %s4387_s0, %s2486_s27 }
  0x13   : > { %v345_v0 = vld [vmem:[%s2492_s30 + $0x38] sm:$0xff]  ;;  %v344_v3 = vld [vmem:[%s2492_s30 + $0x30] sm:$0xff]  ;;  %v343_v8 = vld [vmem:[%s2492_s30 + $0x28] sm:$0xff]  ;;  %s2988_s28 = scalar_lea.vmem %s4389_s2, %s2486_s27 }
  0x14   : > { %v361_v1 = vld [vmem:[%s2492_s30 + $0xb8] sm:$0xff]  ;;  %2162 = vmatpush.xpose.msk.msra.mxu0 %vm4417_vm0, %v345_v0  ;;  %v360_v4 = vld [vmem:[%s2492_s30 + $0xb0] sm:$0xff]  ;;  %v359_v9 = vld [vmem:[%s2492_s30 + $0xa8] sm:$0xff] }
  0x15   : > { %v369_v2 = vld [vmem:[%s2492_s30 + $0xf8] sm:$0xff]  ;;  %2194 = vmatpush.xpose.msk.msra.mxu2 %vm4417_vm0, %v361_v1  ;;  %v368_v6 = vld [vmem:[%s2492_s30 + $0xf0] sm:$0xff]  ;;  %v367_v10 = vld [vmem:[%s2492_s30 + $0xe8] sm:$0xff] }
  0x16   : > { %2210 = vmatpush.xpose.msk.msra.mxu3 %vm4417_vm0, %v369_v2  ;;  %v353_v5 = vld [vmem:[%s2492_s30 + $0x78] sm:$0xff]  ;;  %v352_v7 = vld [vmem:[%s2492_s30 + $0x70] sm:$0xff]  ;;  %v351_v11 = vld [vmem:[%s2492_s30 + $0x68] sm:$0xff] }
  0x17   : > { %2178 = vmatpush.xpose.msk.msra.mxu1 %vm4417_vm0, %v353_v5  ;;  %v342_v12 = vld [vmem:[%s2492_s30 + $0x20] sm:$0xff]  ;;  %v341_v16 = vld [vmem:[%s2492_s30 + $0x18] sm:$0xff]  ;;  %v340_v20 = vld [vmem:[%s2492_s30 + $0x10] sm:$0xff] }
  0x18   : > { %2163 = vmatpush.xpose.msk.msra.mxu0 %vm4417_vm0, %v344_v3  ;;  %v358_v13 = vld [vmem:[%s2492_s30 + $0xa0] sm:$0xff]  ;;  %v357_v17 = vld [vmem:[%s2492_s30 + $0x98] sm:$0xff]  ;;  %v356_v21 = vld [vmem:[%s2492_s30 + $0x90] sm:$0xff] }
  0x19   : > { %2195 = vmatpush.xpose.msk.msra.mxu2 %vm4417_vm0, %v360_v4  ;;  %v366_v14 = vld [vmem:[%s2492_s30 + $0xe0] sm:$0xff]  ;;  %v365_v18 = vld [vmem:[%s2492_s30 + $0xd8] sm:$0xff]  ;;  %v364_v22 = vld [vmem:[%s2492_s30 + $0xd0] sm:$0xff] }
  0x1a   : > { %2211 = vmatpush.xpose.msk.msra.mxu3 %vm4417_vm0, %v368_v6  ;;  %v350_v15 = vld [vmem:[%s2492_s30 + $0x60] sm:$0xff]  ;;  %v349_v19 = vld [vmem:[%s2492_s30 + $0x58] sm:$0xff]  ;;  %v348_v23 = vld [vmem:[%s2492_s30 + $0x50] sm:$0xff] }
  0x1b   : > { %2179 = vmatpush.xpose.msk.msra.mxu1 %vm4417_vm0, %v352_v7  ;;  %v339_v24 = vld [vmem:[%s2492_s30 + $0x8] sm:$0xff]  ;;  %v338_v28 = vld [vmem:[%s2492_s30] sm:$0xff]  ;;  %v308_v40 = vld [vmem:[%s2555_s9 + $0x10] sm:$0xff] }
  0x1c   : > { %2164 = vmatpush.xpose.msk.msra.mxu0 %vm4417_vm0, %v343_v8  ;;  %v355_v25 = vld [vmem:[%s2492_s30 + $0x88] sm:$0xff]  ;;  %v354_v29 = vld [vmem:[%s2492_s30 + $0x80] sm:$0xff]  ;;  %v324_v41 = vld [vmem:[%s2555_s9 + $0x90] sm:$0xff] }
  0x1d   : > { %2196 = vmatpush.xpose.msk.msra.mxu2 %vm4417_vm0, %v359_v9  ;;  %v363_v26 = vld [vmem:[%s2492_s30 + $0xc8] sm:$0xff]  ;;  %v362_v30 = vld [vmem:[%s2492_s30 + $0xc0] sm:$0xff]  ;;  %v332_v42 = vld [vmem:[%s2555_s9 + $0xd0] sm:$0xff] }
  0x1e   : > { %2212 = vmatpush.xpose.msk.msra.mxu3 %vm4417_vm0, %v367_v10  ;;  %v347_v27 = vld [vmem:[%s2492_s30 + $0x48] sm:$0xff]  ;;  %v346_v31 = vld [vmem:[%s2492_s30 + $0x40] sm:$0xff]  ;;  %v316_v43 = vld [vmem:[%s2555_s9 + $0x50] sm:$0xff]  ;;  %s3108_s30 = sld [smem:[#allocation2]] }
  0x1f   : > { %2180 = vmatpush.xpose.msk.msra.mxu1 %vm4417_vm0, %v351_v11  ;;  %v306_v32 = vld [vmem:[%s2555_s9] sm:$0xff]  ;;  %v323_v36 = vld [vmem:[%s2555_s9 + $0x88] sm:$0xff]  ;;  %v325_v44 = vld [vmem:[%s2555_s9 + $0x98] sm:$0xff] }
  0x20   : > { %2165 = vmatpush.xpose.msk.msra.mxu0 %vm4417_vm0, %v342_v12  ;;  %v322_v33 = vld [vmem:[%s2555_s9 + $0x80] sm:$0xff]  ;;  %v307_v37 = vld [vmem:[%s2555_s9 + $0x8] sm:$0xff]  ;;  %v309_v45 = vld [vmem:[%s2555_s9 + $0x18] sm:$0xff] }
  0x21   : > { %2197 = vmatpush.xpose.msk.msra.mxu2 %vm4417_vm0, %v358_v13  ;;  %v330_v34 = vld [vmem:[%s2555_s9 + $0xc0] sm:$0xff]  ;;  %v331_v38 = vld [vmem:[%s2555_s9 + $0xc8] sm:$0xff]  ;;  %v333_v46 = vld [vmem:[%s2555_s9 + $0xd8] sm:$0xff] }
  0x22   : > { %2213 = vmatpush.xpose.msk.msra.mxu3 %vm4417_vm0, %v366_v14  ;;  %v314_v35 = vld [vmem:[%s2555_s9 + $0x40] sm:$0xff]  ;;  %v315_v39 = vld [vmem:[%s2555_s9 + $0x48] sm:$0xff]  ;;  %v317_v47 = vld [vmem:[%s2555_s9 + $0x58] sm:$0xff] }
  0x23   : > { %2181 = vmatpush.xpose.msk.msra.mxu1 %vm4417_vm0, %v350_v15  ;;  %v326_v48 = vld [vmem:[%s2555_s9 + $0xa0] sm:$0xff]  ;;  %v311_v52 = vld [vmem:[%s2555_s9 + $0x28] sm:$0xff]  ;;  %v312_v56 = vld [vmem:[%s2555_s9 + $0x30] sm:$0xff] }
  0x24   : > { %2166 = vmatpush.xpose.msk.msra.mxu0 %vm4417_vm0, %v341_v16  ;;  %v310_v49 = vld [vmem:[%s2555_s9 + $0x20] sm:$0xff]  ;;  %v327_v53 = vld [vmem:[%s2555_s9 + $0xa8] sm:$0xff]  ;;  %v328_v57 = vld [vmem:[%s2555_s9 + $0xb0] sm:$0xff] }
  0x25   : > { %2198 = vmatpush.xpose.msk.msra.mxu2 %vm4417_vm0, %v357_v17  ;;  %v334_v50 = vld [vmem:[%s2555_s9 + $0xe0] sm:$0xff]  ;;  %v335_v54 = vld [vmem:[%s2555_s9 + $0xe8] sm:$0xff]  ;;  %v336_v58 = vld [vmem:[%s2555_s9 + $0xf0] sm:$0xff] }
  0x26   : > { %2214 = vmatpush.xpose.msk.msra.mxu3 %vm4417_vm0, %v365_v18  ;;  %v318_v51 = vld [vmem:[%s2555_s9 + $0x60] sm:$0xff]  ;;  %v319_v55 = vld [vmem:[%s2555_s9 + $0x68] sm:$0xff]  ;;  %v320_v59 = vld [vmem:[%s2555_s9 + $0x70] sm:$0xff] }
  0x27   : > { %2182 = vmatpush.xpose.msk.msra.mxu1 %vm4417_vm0, %v349_v19  ;;  %v313_v60 = vld [vmem:[%s2555_s9 + $0x38] sm:$0xff]  ;;  %v402_v0 = vld [vmem:[%s4390_s3] sm:$0xff]  ;;  %v411_v16 = vld [vmem:[%s4390_s3 + $0x48] sm:$0xff] }
  0x28   : > { %2167 = vmatpush.xpose.msk.msra.mxu0 %vm4417_vm0, %v340_v20  ;;  %v329_v61 = vld [vmem:[%s2555_s9 + $0xb8] sm:$0xff]  ;;  %v791_v2 = vld [vmem:[%s4391_s4] sm:$0xff] }
  0x29   : > { %2199 = vmatpush.xpose.msk.msra.mxu2 %vm4417_vm0, %v356_v21  ;;  %v337_v62 = vld [vmem:[%s2555_s9 + $0xf8] sm:$0xff]  ;;  %v410_v3 = vld [vmem:[%s4390_s3 + $0x40] sm:$0xff] }
  0x2a   : > { %2215 = vmatpush.xpose.msk.msra.mxu3 %vm4417_vm0, %v364_v22  ;;  %v321_v63 = vld [vmem:[%s2555_s9 + $0x78] sm:$0xff]  ;;  %v418_v8 = vld [vmem:[%s4390_s3 + $0x80] sm:$0xff]  ;;  %s4318_s9 = scalar_lea.vmem %s4393_s6, %s2486_s27 }
  0x2b   : > { %2183 = vmatpush.xpose.msk.msra.mxu1 %vm4417_vm0, %v348_v23  ;;  %v426_v13 = vld [vmem:[%s4390_s3 + $0xc0] sm:$0xff]  ;;  %v419_v23 = vld [vmem:[%s4390_s3 + $0x88] sm:$0xff] }
  0x2c   : > { %2168 = vmatpush.xpose.msk.msra.mxu0 %vm4417_vm0, %v339_v24 }
  0x2d   : > { %2200 = vmatpush.xpose.msk.msra.mxu2 %vm4417_vm0, %v355_v25 }
  0x2e   : > { %2216 = vmatpush.xpose.msk.msra.mxu3 %vm4417_vm0, %v363_v26  ;;  %v792_v26 = vld [vmem:[%s4391_s4 + $0x8] sm:$0xff] }
  0x2f   : > { %2184 = vmatpush.xpose.msk.msra.mxu1 %vm4417_vm0, %v347_v27 }
  0x30   : > { %2169 = vmatpush.xpose.msk.msra.mxu0 %vm4417_vm0, %v338_v28  ;;  %v403_v28 = vld [vmem:[%s4390_s3 + $0x8] sm:$0xff] }
  0x31   : > { %2201 = vmatpush.xpose.msk.msra.mxu2 %vm4417_vm0, %v354_v29 }
  0x32   : > { %2217 = vmatpush.xpose.msk.msra.mxu3 %vm4417_vm0, %v362_v30 }
  0x33   : > { %2185 = vmatpush.xpose.msk.msra.mxu1 %vm4417_vm0, %v346_v31  ;;  %2170 = vmatmul.msk.f32.vlgmr.msra.gmra.mxu0 %vm4417_vm0, %v306_v32  ;;  %v427_v31 = vld [vmem:[%s4390_s3 + $0xc8] sm:$0xff]  ;;  %v404_v32 = vld [vmem:[%s4390_s3 + $0x10] sm:$0xff] }
  0x34   : > { %2202 = vmatmul.msk.f32.vlgmr.msra.gmra.mxu2 %vm4417_vm0, %v322_v33 }
  0x35   : > { %2218 = vmatmul.msk.f32.vlgmr.msra.gmra.mxu3 %vm4417_vm0, %v330_v34 }
  0x36   : > { %2186 = vmatmul.msk.f32.vlgmr.msra.gmra.mxu1 %vm4417_vm0, %v314_v35 }
  0x3b   : > { %2171 = vmatmul.msk.f32.gmra.mxu0 %vm4417_vm0, %v307_v37 }
  0x3c   : > { %2203 = vmatmul.msk.f32.gmra.mxu2 %vm4417_vm0, %v323_v36 }
  0x3d   : > { %2219 = vmatmul.msk.f32.gmra.mxu3 %vm4417_vm0, %v331_v38 }
  0x3e   : > { %2187 = vmatmul.msk.f32.gmra.mxu1 %vm4417_vm0, %v315_v39 }
  0x43   : > { %2172 = vmatmul.msk.f32.gmra.mxu0 %vm4417_vm0, %v308_v40 }
  0x44   : > { %2204 = vmatmul.msk.f32.gmra.mxu2 %vm4417_vm0, %v324_v41 }
  0x45   : > { %2220 = vmatmul.msk.f32.gmra.mxu3 %vm4417_vm0, %v332_v42  ;;  %v793_v42 = vld [vmem:[%s4391_s4 + $0x10] sm:$0xff] }
  0x46   : > { %2188 = vmatmul.msk.f32.gmra.mxu1 %vm4417_vm0, %v316_v43 }
  0x4b   : > { %2173 = vmatmul.msk.f32.gmra.mxu0 %vm4417_vm0, %v309_v45 }
  0x4c   : > { %2205 = vmatmul.msk.f32.gmra.mxu2 %vm4417_vm0, %v325_v44 }
  0x4d   : > { %2221 = vmatmul.msk.f32.gmra.mxu3 %vm4417_vm0, %v333_v46 }
  0x4e   : > { %2189 = vmatmul.msk.f32.gmra.mxu1 %vm4417_vm0, %v317_v47 }
  0x53   : > { %2174 = vmatmul.msk.f32.gmra.mxu0 %vm4417_vm0, %v310_v49  ;;  %v428_v49 = vld [vmem:[%s4390_s3 + $0xd0] sm:$0xff] }
  0x54   : > { %2206 = vmatmul.msk.f32.gmra.mxu2 %vm4417_vm0, %v326_v48  ;;  %v412_v48 = vld [vmem:[%s4390_s3 + $0x50] sm:$0xff] }
  0x55   : > { %2222 = vmatmul.msk.f32.gmra.mxu3 %vm4417_vm0, %v334_v50 }
  0x56   : > { %2190 = vmatmul.msk.f32.gmra.mxu1 %vm4417_vm0, %v318_v51 }
  0x5b   : > { %2175 = vmatmul.msk.f32.gmra.mxu0 %vm4417_vm0, %v311_v52 }
  0x5c   : > { %2207 = vmatmul.msk.f32.gmra.mxu2 %vm4417_vm0, %v327_v53 }
  0x5d   : > { %2223 = vmatmul.msk.f32.gmra.mxu3 %vm4417_vm0, %v335_v54 }
  0x5e   : > { %2191 = vmatmul.msk.f32.gmra.mxu1 %vm4417_vm0, %v319_v55 }
  0x63   : > { %2176 = vmatmul.msk.f32.gmra.mxu0 %vm4417_vm0, %v312_v56 }
  0x64   : > { %2208 = vmatmul.msk.f32.gmra.mxu2 %vm4417_vm0, %v328_v57  ;;  %v429_v57 = vld [vmem:[%s4390_s3 + $0xd8] sm:$0xff] }
  0x65   : > { %2224 = vmatmul.msk.f32.gmra.mxu3 %vm4417_vm0, %v336_v58 }
  0x66   : > { %2192 = vmatmul.msk.f32.gmra.mxu1 %vm4417_vm0, %v320_v59 }
  0x6b   : > { %2177 = vmatmul.msk.f32.gmra.mxu0 %vm4417_vm0, %v313_v60 }
  0x6c   : > { %2209 = vmatmul.msk.f32.gmra.mxu2 %vm4417_vm0, %v329_v61  ;;  %v794_v61 = vld [vmem:[%s4391_s4 + $0x18] sm:$0xff] }
  0x6d   : > { %2225 = vmatmul.msk.f32.gmra.mxu3 %vm4417_vm0, %v337_v62  ;;  %v420_v62 = vld [vmem:[%s4390_s3 + $0x90] sm:$0xff] }
  0x6e   : > { %2193 = vmatmul.msk.f32.gmra.mxu1 %vm4417_vm0, %v321_v63 }
  0xb0   : > { %v500_v1 = vpop.f32.mrf.mxu0 }
  0xb1   : > { %v501_v4 = vadd.f32 %v500_v1, %v402_v0  ;;  %v413_v0 = vld [vmem:[%s4390_s3 + $0x58] sm:$0xff] }
  0xb3   : > { %v589_v5 = vpop.f32.mrf.mxu1  ;;  %v2637_v6 = vadd.f32 %v791_v2, %v501_v4 }
  0xb4   : > { %v590_v7 = vadd.f32 %v589_v5, %v410_v3 }
  0xb5   : > { %v832_v9 = vsel %vm4418_vm1, %v2637_v6, -inf }
  0xb6   : > { %833 = vmax.xlane.f32.xlu1 %v832_v9  ;;  %v2644_v12 = vadd.f32 %v791_v2, %v590_v7 }
  0xb7   : > { %v678_v10 = vpop.f32.mrf.mxu2 }
  0xb8   : > { %v679_v11 = vadd.f32 %v678_v10, %v418_v8  ;;  %v767_v14 = vpop.f32.mrf.mxu3  ;;  %v503_v15 = vpop.f32.mrf.mxu0  ;;  %v856_v21 = vsel %vm4418_vm1, %v2644_v12, -inf }
  0xb9   : > { %v768_v18 = vadd.f32 %v767_v14, %v426_v13  ;;  %v504_v35 = vadd.f32 %v503_v15, %v403_v28  ;;  %v795_v13 = vld [vmem:[%s4391_s4 + $0x20] sm:$0xff] }
  0xba   : > { %v2652_v17 = vadd.f32 %v791_v2, %v679_v11 }
  0xbb   : > { %v592_v19 = vpop.f32.mrf.mxu1  ;;  %v2661_v24 = vadd.f32 %v791_v2, %v768_v18  ;;  %v2688_v43 = vadd.f32 %v792_v26, %v504_v35  ;;  %v414_v2 = vld [vmem:[%s4390_s3 + $0x60] sm:$0xff]  ;;  %v405_v18 = vld [vmem:[%s4390_s3 + $0x18] sm:$0xff] }
  0xbc   : > { %v880_v20 = vsel %vm4418_vm1, %v2652_v17, -inf  ;;  %v593_v22 = vadd.f32 %v592_v19, %v411_v16 }
  0xbd   : > { %881 = vmax.xlane.f32.xlu0 %v880_v20  ;;  %v904_v36 = vsel %vm4418_vm1, %v2661_v24, -inf  ;;  %v835_v50 = vsel %vm4418_vm1, %v2688_v43, -inf  ;;  %v421_v20 = vld [vmem:[%s4390_s3 + $0x98] sm:$0xff] }
  0xbe   : > { %857 = vmax.xlane.f32.xlu1 %v856_v21  ;;  %v2669_v29 = vadd.f32 %v792_v26, %v593_v22  ;;  %v422_v21 = vld [vmem:[%s4390_s3 + $0xa0] sm:$0xff] }
  0xbf   : > { %v681_v25 = vpop.f32.mrf.mxu2 }
  0xc0   : > { %v682_v27 = vadd.f32 %v681_v25, %v419_v23  ;;  %v770_v30 = vpop.f32.mrf.mxu3  ;;  %v506_v33 = vpop.f32.mrf.mxu0  ;;  %v859_v40 = vsel %vm4418_vm1, %v2669_v29, -inf }
  0xc1   : > { %v771_v38 = vadd.f32 %v770_v30, %v427_v31  ;;  %v507_v41 = vadd.f32 %v506_v33, %v404_v32  ;;  %v430_v33 = vld [vmem:[%s4390_s3 + $0xe0] sm:$0xff] }
  0xc2   : > { %v2677_v34 = vadd.f32 %v792_v26, %v682_v27 }
  0xc3   : > { %v595_v37 = vpop.f32.mrf.mxu1  ;;  %v2690_v45 = vadd.f32 %v792_v26, %v771_v38  ;;  %v2692_v46 = vadd.f32 %v793_v42, %v507_v41  ;;  %v406_v38 = vld [vmem:[%s4390_s3 + $0x20] sm:$0xff] }
  0xc4   : > { %v883_v39 = vsel %vm4418_vm1, %v2677_v34, -inf  ;;  %v596_v53 = vadd.f32 %v595_v37, %v412_v48 }
  0xc5   : > { %884 = vmax.xlane.f32.xlu2 %v883_v39  ;;  %905 = vmax.xlane.f32.xlu0 %v904_v36  ;;  %v907_v55 = vsel %vm4418_vm1, %v2690_v45, -inf  ;;  %v838_v56 = vsel %vm4418_vm1, %v2692_v46, -inf  ;;  %v407_v39 = vld [vmem:[%s4390_s3 + $0x28] sm:$0xff] }
  0xc6   : > { %860 = vmax.xlane.f32.xlu1 %v859_v40  ;;  %v2709_v59 = vadd.f32 %v793_v42, %v596_v53 }
  0xc7   : > { %v684_v44 = vpop.f32.mrf.mxu2 }
  0xc8   : > { %v773_v47 = vpop.f32.mrf.mxu3  ;;  %v509_v52 = vpop.f32.mrf.mxu0  ;;  %v685_v3 = vadd.f32 %v684_v44, %v420_v62  ;;  %v862_v8 = vsel %vm4418_vm1, %v2709_v59, -inf }
  0xc9   : > { %v774_v54 = vadd.f32 %v773_v47, %v428_v49  ;;  %v510_v23 = vadd.f32 %v509_v52, %v405_v18  ;;  %v796_v49 = vld [vmem:[%s4391_s4 + $0x28] sm:$0xff]  ;;  %v432_v18 = vld [vmem:[%s4390_s3 + $0xf0] sm:$0xff] }
  0xca   : > { %v2736_v15 = vadd.f32 %v793_v42, %v685_v3  ;;  %v415_v52 = vld [vmem:[%s4390_s3 + $0x68] sm:$0xff] }
  0xcb   : > { %v598_v51 = vpop.f32.mrf.mxu1  ;;  %v2711_v60 = vadd.f32 %v793_v42, %v774_v54  ;;  %v2757_v32 = vadd.f32 %v794_v61, %v510_v23  ;;  %v431_v54 = vld [vmem:[%s4390_s3 + $0xe8] sm:$0xff] }
  0xcc   : > { %v599_v7 = vadd.f32 %v598_v51, %v413_v0  ;;  %v886_v25 = vsel %vm4418_vm1, %v2736_v15, -inf }
  0xcd   : > { %908 = vmax.xlane.f32.xlu2 %v907_v55  ;;  %836 = vmax.xlane.f32.xlu0 %v835_v50  ;;  %v910_v9 = vsel %vm4418_vm1, %v2711_v60, -inf  ;;  %v841_v41 = vsel %vm4418_vm1, %v2757_v32, -inf }
  0xce   : > { %839 = vmax.xlane.f32.xlu1 %v838_v56  ;;  %v2738_v16 = vadd.f32 %v794_v61, %v599_v7 }
  0xcf   : > { %v687_v58 = vpop.f32.mrf.mxu2 }
  0xd0   : > { %v776_v63 = vpop.f32.mrf.mxu3  ;;  %v512_v14 = vpop.f32.mrf.mxu0  ;;  %v688_v26 = vadd.f32 %v687_v58, %v421_v20  ;;  %v865_v27 = vsel %vm4418_vm1, %v2738_v16, -inf  ;;  %v408_v58 = vld [vmem:[%s4390_s3 + $0x30] sm:$0xff] }
  0xd1   : > { %v777_v1 = vadd.f32 %v776_v63, %v429_v57  ;;  %v513_v42 = vadd.f32 %v512_v14, %v406_v38  ;;  %v423_v14 = vld [vmem:[%s4390_s3 + $0xa8] sm:$0xff]  ;;  %v416_v38 = vld [vmem:[%s4390_s3 + $0x70] sm:$0xff] }
  0xd2   : > { %v2762_v36 = vadd.f32 %v794_v61, %v688_v26 }
  0xd3   : > { %v2725_v4 = vadd.f32 %v794_v61, %v777_v1  ;;  %v601_v5 = vpop.f32.mrf.mxu1  ;;  %v2789_v56 = vadd.f32 %v795_v13, %v513_v42 }
  0xd4   : > { %v602_v10 = vadd.f32 %v601_v5, %v414_v2  ;;  %v889_v44 = vsel %vm4418_vm1, %v2762_v36, -inf  ;;  %v797_v5 = vld [vmem:[%s4391_s4 + $0x30] sm:$0xff] }
  0xd5   : > { %863 = vmax.xlane.f32.xlu2 %v862_v8  ;;  %911 = vmax.xlane.f32.xlu0 %v910_v9  ;;  %v913_v11 = vsel %vm4418_vm1, %v2725_v4, -inf  ;;  %v844_v1 = vsel %vm4418_vm1, %v2789_v56, -inf  ;;  %v424_v9 = vld [vmem:[%s4390_s3 + $0xb0] sm:$0xff] }
  0xd6   : > { %914 = vmax.xlane.f32.xlu1 %v913_v11  ;;  %v2743_v19 = vadd.f32 %v795_v13, %v602_v10 }
  0xd7   : > { %v690_v22 = vpop.f32.mrf.mxu2 }
  0xd8   : > { %v868_v28 = vsel %vm4418_vm1, %v2743_v19, -inf  ;;  %v691_v30 = vadd.f32 %v690_v22, %v422_v21  ;;  %v779_v31 = vpop.f32.mrf.mxu3  ;;  %v515_v35 = vpop.f32.mrf.mxu0 }
  0xd9   : > { %v780_v40 = vadd.f32 %v779_v31, %v430_v33  ;;  %v516_v48 = vadd.f32 %v515_v35, %v407_v39  ;;  %v417_v39 = vld [vmem:[%s4390_s3 + $0x78] sm:$0xff] }
  0xda   : > { %v2764_v37 = vadd.f32 %v795_v13, %v691_v30  ;;  %v409_v30 = vld [vmem:[%s4390_s3 + $0x38] sm:$0xff] }
  0xdb   : > { %v2781_v51 = vadd.f32 %v795_v13, %v780_v40  ;;  %v604_v53 = vpop.f32.mrf.mxu1  ;;  %v2791_v57 = vadd.f32 %v796_v49, %v516_v48 }
  0xdc   : > { %v892_v47 = vsel %vm4418_vm1, %v2764_v37, -inf  ;;  %v605_v63 = vadd.f32 %v604_v53, %v415_v52  ;;  %v425_v53 = vld [vmem:[%s4390_s3 + $0xb8] sm:$0xff] }
  0xdd   : > { %887 = vmax.xlane.f32.xlu2 %v886_v25  ;;  %866 = vmax.xlane.f32.xlu0 %v865_v27  ;;  %v916_v62 = vsel %vm4418_vm1, %v2781_v51, -inf  ;;  %v847_v2 = vsel %vm4418_vm1, %v2791_v57, -inf }
  0xde   : > { %869 = vmax.xlane.f32.xlu1 %v868_v28  ;;  %v2805_v7 = vadd.f32 %v796_v49, %v605_v63 }
  0xdf   : > { %v693_v50 = vpop.f32.mrf.mxu2 }
  0xe0   : > { %v782_v55 = vpop.f32.mrf.mxu3  ;;  %v518_v61 = vpop.f32.mrf.mxu0  ;;  %v871_v21 = vsel %vm4418_vm1, %v2805_v7, -inf  ;;  %v694_v25 = vadd.f32 %v693_v50, %v423_v14 }
  0xe1   : > { %v783_v0 = vadd.f32 %v782_v55, %v431_v54  ;;  %v519_v3 = vadd.f32 %v518_v61, %v408_v58  ;;  %v433_v61 = vld [vmem:[%s4390_s3 + $0xf8] sm:$0xff] }
  0xe2   : > { %v2831_v33 = vadd.f32 %v796_v49, %v694_v25 }
  0xe3   : > { %v2807_v8 = vadd.f32 %v796_v49, %v783_v0  ;;  %v607_v11 = vpop.f32.mrf.mxu1  ;;  %v2812_v13 = vadd.f32 %v797_v5, %v519_v3 }
  0xe4   : > { %v895_v48 = vsel %vm4418_vm1, %v2831_v33, -inf }
  0xe5   : > { %842 = vmax.xlane.f32.xlu2 %v841_v41  ;;  %890 = vmax.xlane.f32.xlu0 %v889_v44  ;;  %v919_v22 = vsel %vm4418_vm1, %v2807_v8, -inf  ;;  %v850_v26 = vsel %vm4418_vm1, %v2812_v13, -inf  ;;  %v798_v44 = vld [vmem:[%s4391_s4 + $0x38] sm:$0xff] }
  0xe6   : > { %893 = vmax.xlane.f32.xlu1 %v892_v47  ;;  %v608_v47 = vadd.f32 %v607_v11, %v416_v38 }
  0xe7   : > { %v696_v10 = vpop.f32.mrf.mxu2 }
  0xe8   : > { %v785_v20 = vpop.f32.mrf.mxu3  ;;  %v697_v23 = vadd.f32 %v696_v10, %v424_v9  ;;  %v521_v31 = vpop.f32.mrf.mxu0  ;;  %v2855_v55 = vadd.f32 %v797_v5, %v608_v47 }
  0xe9   : > { %v786_v27 = vadd.f32 %v785_v20, %v432_v18  ;;  %v522_v42 = vadd.f32 %v521_v31, %v409_v30 }
  0xea   : > { %v2826_v28 = vadd.f32 %v797_v5, %v697_v23 }
  0xeb   : > { %v2833_v35 = vadd.f32 %v797_v5, %v786_v27  ;;  %v610_v40 = vpop.f32.mrf.mxu1  ;;  %v2850_v52 = vadd.f32 %v798_v44, %v522_v42 }
  0xec   : > { %v898_v41 = vsel %vm4418_vm1, %v2826_v28, -inf  ;;  %v611_v50 = vadd.f32 %v610_v40, %v417_v39 }
  0xed   : > { %917 = vmax.xlane.f32.xlu2 %v916_v62  ;;  %845 = vmax.xlane.f32.xlu0 %v844_v1  ;;  %v922_v49 = vsel %vm4418_vm1, %v2833_v35, -inf  ;;  %v853_v63 = vsel %vm4418_vm1, %v2850_v52, -inf  ;;  %v874_v1 = vsel %vm4418_vm1, %v2855_v55, -inf }
  0xee   : > { %848 = vmax.xlane.f32.xlu1 %v847_v2  ;;  %v2857_v58 = vadd.f32 %v798_v44, %v611_v50 }
  0xef   : > { %v699_v54 = vpop.f32.mrf.mxu2 }
  0xf0   : > { %v788_v62 = vpop.f32.mrf.mxu3  ;;  %v700_v0 = vadd.f32 %v699_v54, %v425_v53  ;;  %v877_v2 = vsel %vm4418_vm1, %v2857_v58, -inf }
  0xf1   : > { %v789_v3 = vadd.f32 %v788_v62, %v433_v61 }
  0xf2   : > { %v2868_v5 = vadd.f32 %v798_v44, %v700_v0 }
  0xf3   : > { %v2870_v9 = vadd.f32 %v798_v44, %v789_v3 }
  0xf4   : > { %v901_v10 = vsel %vm4418_vm1, %v2868_v5, -inf }
  0xf5   : > { %872 = vmax.xlane.f32.xlu2 %v871_v21  ;;  %920 = vmax.xlane.f32.xlu0 %v919_v22  ;;  %v925_v11 = vsel %vm4418_vm1, %v2870_v9, -inf }
  0xf6   : > { %851 = vmax.xlane.f32.xlu1 %v850_v26 }
  0xfd   : > { %896 = vmax.xlane.f32.xlu2 %v895_v48  ;;  %899 = vmax.xlane.f32.xlu0 %v898_v41 }
  0xfe   : > { %923 = vmax.xlane.f32.xlu1 %v922_v49 }
 0x105   : > { %875 = vmax.xlane.f32.xlu2 %v874_v1  ;;  %854 = vmax.xlane.f32.xlu0 %v853_v63 }
 0x106   : > { %878 = vmax.xlane.f32.xlu1 %v877_v2 }
 0x10d   : > { %902 = vmax.xlane.f32.xlu0 %v901_v10 }
 0x10e   : > { %926 = vmax.xlane.f32.xlu1 %v925_v11 }
 0x129   : > { %v834_v14 = vpop.xlane.xlu1 %833 }
 0x12a   : > { %v928_v18 = vsub.f32 %v2637_v6, %v834_v14 }
 0x12c   : > { %v960_v20 = vmul.f32 1.442695, %v928_v18 }
 0x12e   : > { %2284 = vpow2.f32 %v960_v20 }
 0x130   : > { %v882_v21 = vpop.xlane.xlu0 %881 }
 0x131   : > { %v944_v22 = vsub.f32 %v2652_v17, %v882_v21  ;;  %v858_v23 = vpop.xlane.xlu1 %857 }
 0x132   : > { %v936_v26 = vsub.f32 %v2644_v12, %v858_v23 }
 0x133   : > { %v992_v25 = vmul.f32 1.442695, %v944_v22 }
 0x134   : > { %v2879_v27 = vpop.eup %2284  ;;  %v976_v30 = vmul.f32 1.442695, %v936_v26 }
 0x135   : > { %2286 = vpow2.f32 %v992_v25  ;;  %v1024_v31 = vsel %vm4418_vm1, %v2879_v27, 0.0 }
 0x136   : > { %2288 = vpow2.f32 %v976_v30  ;;  %1025 = vadd.xlane.f32.xlu2 %v1024_v31 }
 0x138   : > { %v885_v38 = vpop.xlane.xlu2 %884  ;;  %v906_v39 = vpop.xlane.xlu0 %905 }
 0x139   : > { %v945_v40 = vsub.f32 %v2677_v34, %v885_v38  ;;  %v952_v41 = vsub.f32 %v2661_v24, %v906_v39  ;;  %v861_v42 = vpop.xlane.xlu1 %860 }
 0x13a   : > { %v937_v50 = vsub.f32 %v2669_v29, %v861_v42 }
 0x13b   : > { %v2885_v44 = vpop.eup %2286  ;;  %v994_v47 = vmul.f32 1.442695, %v945_v40  ;;  %v1008_v48 = vmul.f32 1.442695, %v952_v41 }
 0x13c   : > { %v2887_v49 = vpop.eup %2288  ;;  %v1072_v53 = vsel %vm4418_vm1, %v2885_v44, 0.0  ;;  %v978_v63 = vmul.f32 1.442695, %v937_v50 }
 0x13d   : > { %2290 = vpow2.f32 %v994_v47  ;;  %v1048_v54 = vsel %vm4418_vm1, %v2887_v49, 0.0 }
 0x13e   : > { %2292 = vpow2.f32 %v1008_v48  ;;  %1073 = vadd.xlane.f32.xlu2 %v1072_v53  ;;  %1049 = vadd.xlane.f32.xlu0 %v1048_v54 }
 0x13f   : > { %2294 = vpow2.f32 %v978_v63 }
 0x140   : > { %v909_v61 = vpop.xlane.xlu2 %908  ;;  %v837_v62 = vpop.xlane.xlu0 %836 }
 0x141   : > { %v929_v0 = vsub.f32 %v2688_v43, %v837_v62  ;;  %v840_v1 = vpop.xlane.xlu1 %839  ;;  %v953_v3 = vsub.f32 %v2690_v45, %v909_v61 }
 0x142   : > { %v930_v14 = vsub.f32 %v2692_v46, %v840_v1 }
 0x143   : > { %v2895_v2 = vpop.eup %2290  ;;  %v962_v10 = vmul.f32 1.442695, %v929_v0  ;;  %v1010_v21 = vmul.f32 1.442695, %v953_v3 }
 0x144   : > { %v2898_v11 = vpop.eup %2292  ;;  %v1075_v18 = vsel %vm4418_vm1, %v2895_v2, 0.0  ;;  %v964_v22 = vmul.f32 1.442695, %v930_v14 }
 0x145   : > { %1076 = vadd.xlane.f32.xlu1 %v1075_v18  ;;  %2296 = vpow2.f32 %v962_v10  ;;  %v1096_v20 = vsel %vm4418_vm1, %v2898_v11, 0.0  ;;  %v2906_v31 = vpop.eup %2294 }
 0x146   : > { %1097 = vadd.xlane.f32.xlu0 %v1096_v20  ;;  %2298 = vpow2.f32 %v1010_v21  ;;  %v1051_v47 = vsel %vm4418_vm1, %v2906_v31, 0.0 }
 0x147   : > { %2300 = vpow2.f32 %v964_v22 }
 0x148   : > { %v864_v23 = vpop.xlane.xlu2 %863  ;;  %v912_v25 = vpop.xlane.xlu0 %911 }
 0x149   : > { %v938_v26 = vsub.f32 %v2709_v59, %v864_v23  ;;  %v915_v30 = vpop.xlane.xlu1 %914  ;;  %v954_v39 = vsub.f32 %v2711_v60, %v912_v25 }
 0x14a   : > { %v955_v41 = vsub.f32 %v2725_v4, %v915_v30 }
 0x14b   : > { %v980_v38 = vmul.f32 1.442695, %v938_v26  ;;  %v2909_v40 = vpop.eup %2296  ;;  %v1012_v48 = vmul.f32 1.442695, %v954_v39 }
 0x14c   : > { %v1027_v42 = vsel %vm4418_vm1, %v2909_v40, 0.0  ;;  %v1014_v50 = vmul.f32 1.442695, %v955_v41  ;;  %v2916_v61 = vpop.eup %2298 }
 0x14d   : > { %2302 = vpow2.f32 %v980_v38  ;;  %1028 = vadd.xlane.f32.xlu2 %v1027_v42  ;;  %v2919_v63 = vpop.eup %2300  ;;  %v1099_v20 = vsel %vm4418_vm1, %v2916_v61, 0.0 }
 0x14e   : > { %1052 = vadd.xlane.f32.xlu0 %v1051_v47  ;;  %2304 = vpow2.f32 %v1012_v48  ;;  %v1030_v21 = vsel %vm4418_vm1, %v2919_v63, 0.0 }
 0x14f   : > { %2306 = vpow2.f32 %v1014_v50 }
 0x150   : > { %v888_v53 = vpop.xlane.xlu2 %887  ;;  %v867_v54 = vpop.xlane.xlu0 %866 }
 0x151   : > { %v946_v62 = vsub.f32 %v2736_v15, %v888_v53  ;;  %v870_v0 = vpop.xlane.xlu1 %869  ;;  %v939_v10 = vsub.f32 %v2738_v16, %v867_v54 }
 0x152   : > { %v940_v14 = vsub.f32 %v2743_v19, %v870_v0 }
 0x153   : > { %v2921_v1 = vpop.eup %2302  ;;  %v996_v3 = vmul.f32 1.442695, %v946_v62  ;;  %v982_v22 = vmul.f32 1.442695, %v939_v10 }
 0x154   : > { %v1054_v18 = vsel %vm4418_vm1, %v2921_v1, 0.0  ;;  %v984_v23 = vmul.f32 1.442695, %v940_v14  ;;  %v2931_v30 = vpop.eup %2304 }
 0x155   : > { %2308 = vpow2.f32 %v996_v3  ;;  %1055 = vadd.xlane.f32.xlu1 %v1054_v18  ;;  %1100 = vadd.xlane.f32.xlu2 %v1099_v20  ;;  %4419 = vst [vmem:[#allocation5_spill] sm:$0xff] %v2931_v30  ;;  %v2934_v39 = vpop.eup %2306  ;;  %v1102_v54 = vsel %vm4418_vm1, %v2931_v30, 0.0 }
 0x156   : > { %1031 = vadd.xlane.f32.xlu0 %v1030_v21  ;;  %4420 = vst [vmem:[#allocation6_spill] sm:$0xff] %v2934_v39  ;;  %2310 = vpow2.f32 %v982_v22  ;;  %v1105_v62 = vsel %vm4418_vm1, %v2934_v39, 0.0 }
 0x157   : > { %2312 = vpow2.f32 %v984_v23 }
 0x158   : > { %v843_v25 = vpop.xlane.xlu2 %842  ;;  %v891_v26 = vpop.xlane.xlu0 %890 }
 0x159   : > { %v931_v38 = vsub.f32 %v2757_v32, %v843_v25  ;;  %v894_v41 = vpop.xlane.xlu1 %893  ;;  %v947_v48 = vsub.f32 %v2762_v36, %v891_v26 }
 0x15a   : > { %v948_v50 = vsub.f32 %v2764_v37, %v894_v41 }
 0x15b   : > { %v2936_v42 = vpop.eup %2308  ;;  %v966_v47 = vmul.f32 1.442695, %v931_v38  ;;  %v998_v0 = vmul.f32 1.442695, %v947_v48 }
 0x15c   : > { %v1078_v53 = vsel %vm4418_vm1, %v2936_v42, 0.0  ;;  %v1000_v3 = vmul.f32 1.442695, %v948_v50  ;;  %v2946_v18 = vpop.eup %2310 }
 0x15d   : > { %2314 = vpow2.f32 %v966_v47  ;;  %1079 = vadd.xlane.f32.xlu1 %v1078_v53  ;;  %1103 = vadd.xlane.f32.xlu2 %v1102_v54  ;;  %4421 = vst [vmem:[#allocation7_spill] sm:$0xff] %v2946_v18  ;;  %v2949_v21 = vpop.eup %2312  ;;  %v1057_v47 = vsel %vm4418_vm1, %v2946_v18, 0.0 }
 0x15e   : > { %1106 = vadd.xlane.f32.xlu0 %v1105_v62  ;;  %4422 = vst [vmem:[#allocation8_spill] sm:$0xff] %v2949_v21  ;;  %2316 = vpow2.f32 %v998_v0  ;;  %v1060_v48 = vsel %vm4418_vm1, %v2949_v21, 0.0  ;;  %v400_v21 = vld [vmem:[%s2988_s28 + $0xf0] sm:$0xff] }
 0x15f   : > { %2318 = vpow2.f32 %v1000_v3 }
 0x160   : > { %v918_v10 = vpop.xlane.xlu2 %917  ;;  %v846_v14 = vpop.xlane.xlu0 %845 }
 0x161   : > { %v956_v20 = vsub.f32 %v2781_v51, %v918_v10  ;;  %v849_v22 = vpop.xlane.xlu1 %848  ;;  %v932_v26 = vsub.f32 %v2789_v56, %v846_v14 }
 0x162   : > { %v933_v38 = vsub.f32 %v2791_v57, %v849_v22 }
 0x163   : > { %v2951_v23 = vpop.eup %2314  ;;  %v1016_v25 = vmul.f32 1.442695, %v956_v20  ;;  %v968_v50 = vmul.f32 1.442695, %v932_v26 }
 0x164   : > { %4423 = vst [vmem:[#allocation9_spill] sm:$0xff] %v2951_v23  ;;  %v1033_v41 = vsel %vm4418_vm1, %v2951_v23, 0.0  ;;  %v970_v53 = vmul.f32 1.442695, %v933_v38  ;;  %v2961_v0 = vpop.eup %2316  ;;  %v1612_v23 = vmax.f32 %v2743_v19, 0.0 }
 0x165   : > { %2320 = vpow2.f32 %v1016_v25  ;;  %1034 = vadd.xlane.f32.xlu1 %v1033_v41  ;;  %1058 = vadd.xlane.f32.xlu2 %v1057_v47  ;;  %4424 = vst [vmem:[#allocation10_spill] sm:$0xff] %v2961_v0  ;;  %v2964_v10 = vpop.eup %2318  ;;  %v1081_v38 = vsel %vm4418_vm1, %v2961_v0, 0.0 }
 0x166   : > { %1061 = vadd.xlane.f32.xlu0 %v1060_v48  ;;  %4425 = vst [vmem:[#allocation11_spill] sm:$0xff] %v2964_v10  ;;  %2322 = vpow2.f32 %v968_v50  ;;  %v1084_v41 = vsel %vm4418_vm1, %v2964_v10, 0.0  ;;  %v377_v10 = vld [vmem:[%s2988_s28 + $0x38] sm:$0xff] }
 0x167   : > { %2324 = vpow2.f32 %v970_v53  ;;  %1796 = vmatpush.msrb.mxu0 %v377_v10 }
 0x168   : > { %v873_v54 = vpop.xlane.xlu2 %872  ;;  %v921_v62 = vpop.xlane.xlu0 %920 }
 0x169   : > { %v941_v3 = vsub.f32 %v2805_v7, %v873_v54  ;;  %v852_v14 = vpop.xlane.xlu1 %851  ;;  %v957_v25 = vsub.f32 %v2807_v8, %v921_v62 }
 0x16b   : > { %v2966_v20 = vpop.eup %2320  ;;  %v986_v22 = vmul.f32 1.442695, %v941_v3  ;;  %v1018_v47 = vmul.f32 1.442695, %v957_v25 }
 0x16c   : > { %4426 = vst [vmem:[#allocation12_spill] sm:$0xff] %v2966_v20  ;;  %v1108_v26 = vsel %vm4418_vm1, %v2966_v20, 0.0  ;;  %v2975_v53 = vpop.eup %2322 }
 0x16d   : > { %2326 = vpow2.f32 %v986_v22  ;;  %1109 = vadd.xlane.f32.xlu1 %v1108_v26  ;;  %1082 = vadd.xlane.f32.xlu2 %v1081_v38  ;;  %4427 = vst [vmem:[#allocation13_spill] sm:$0xff] %v2975_v53  ;;  %v2978_v62 = vpop.eup %2324  ;;  %v934_v26 = vsub.f32 %v2812_v13, %v852_v14 }
 0x16e   : > { %1085 = vadd.xlane.f32.xlu0 %v1084_v41  ;;  %4428 = vst [vmem:[#allocation14_spill] sm:$0xff] %v2978_v62  ;;  %2328 = vpow2.f32 %v1018_v47  ;;  %v401_v47 = vld [vmem:[%s2988_s28 + $0xf8] sm:$0xff] }
 0x16f   : > { %v972_v0 = vmul.f32 1.442695, %v934_v26  ;;  %1991 = vmatpush.msrb.mxu3 %v401_v47 }
 0x170   : > { %v897_v48 = vpop.xlane.xlu2 %896  ;;  %v900_v50 = vpop.xlane.xlu0 %899 }
 0x171   : > { %v949_v54 = vsub.f32 %v2831_v33, %v897_v48  ;;  %v924_v3 = vpop.xlane.xlu1 %923  ;;  %v950_v25 = vsub.f32 %v2826_v28, %v900_v50  ;;  %v1036_v48 = vsel %vm4418_vm1, %v2975_v53, 0.0  ;;  %v385_v50 = vld [vmem:[%s2988_s28 + $0x78] sm:$0xff]  ;;  %1992 = vmatpush.msrb.mxu3 %v400_v21 }
 0x172   : > { %v958_v38 = vsub.f32 %v2833_v35, %v924_v3  ;;  %v393_v3 = vld [vmem:[%s2988_s28 + $0xb8] sm:$0xff]  ;;  %1861 = vmatpush.msrb.mxu1 %v385_v50 }
 0x173   : > { %v2980_v22 = vpop.eup %2326  ;;  %v1002_v20 = vmul.f32 1.442695, %v949_v54  ;;  %v1039_v54 = vsel %vm4418_vm1, %v2978_v62, 0.0  ;;  %1926 = vmatpush.msrb.mxu2 %v393_v3 }
 0x174   : > { %4429 = vst [vmem:[#allocation15_spill] sm:$0xff] %v2980_v22  ;;  %v1063_v41 = vsel %vm4418_vm1, %v2980_v22, 0.0  ;;  %v1020_v14 = vmul.f32 1.442695, %v958_v38  ;;  %v392_v22 = vld [vmem:[%s2988_s28 + $0xb0] sm:$0xff] }
 0x175   : > { %2330 = vpow2.f32 %v1002_v20  ;;  %1064 = vadd.xlane.f32.xlu1 %v1063_v41  ;;  %1037 = vadd.xlane.f32.xlu2 %v1036_v48  ;;  %v1004_v20 = vmul.f32 1.442695, %v950_v25  ;;  %v3003_v48 = vpop.eup %2328 }
 0x176   : > { %2332 = vpow2.f32 %v1020_v14  ;;  %1040 = vadd.xlane.f32.xlu0 %v1039_v54  ;;  %1927 = vmatpush.msrb.mxu2 %v392_v22  ;;  %4430 = vst [vmem:[#allocation16_spill] sm:$0xff] %v3003_v48  ;;  %v1111_v10 = vsel %vm4418_vm1, %v3003_v48, 0.0 }
 0x177   : > { %2334 = vpow2.f32 %v972_v0 }
 0x178   : > { %v855_v38 = vpop.xlane.xlu0 %854  ;;  %v876_v41 = vpop.xlane.xlu2 %875  ;;  %2336 = vpow2.f32 %v1004_v20 }
 0x179   : > { %v879_v62 = vpop.xlane.xlu1 %878  ;;  %v942_v26 = vsub.f32 %v2855_v55, %v876_v41 }
 0x17a   : > { %v943_v20 = vsub.f32 %v2857_v58, %v879_v62 }
 0x17b   : > { %v3005_v53 = vpop.eup %2330  ;;  %v988_v21 = vmul.f32 1.442695, %v942_v26 }
 0x17c   : > { %4431 = vst [vmem:[#allocation17_spill] sm:$0xff] %v3005_v53  ;;  %v1087_v14 = vsel %vm4418_vm1, %v3005_v53, 0.0  ;;  %v3010_v25 = vpop.eup %2332 }
 0x17d   : > { %4432 = vst [vmem:[#allocation18_spill] sm:$0xff] %v3010_v25  ;;  %1088 = vadd.xlane.f32.xlu1 %v1087_v14  ;;  %1112 = vadd.xlane.f32.xlu2 %v1111_v10  ;;  %v1114_v22 = vsel %vm4418_vm1, %v3010_v25, 0.0  ;;  %v3016_v0 = vpop.eup %2334  ;;  %2338 = vpow2.f32 %v988_v21  ;;  %v935_v10 = vsub.f32 %v2850_v52, %v855_v38 }
 0x17e   : > { %1115 = vadd.xlane.f32.xlu0 %v1114_v22  ;;  %4433 = vst [vmem:[#allocation19_spill] sm:$0xff] %v3016_v0  ;;  %v3019_v47 = vpop.eup %2336  ;;  %v1042_v22 = vsel %vm4418_vm1, %v3016_v0, 0.0  ;;  %v395_v0 = vld [vmem:[%s2988_s28 + $0xc8] sm:$0xff] }
 0x17f   : > { %4434 = vst [vmem:[#allocation20_spill] sm:$0xff] %v3019_v47  ;;  %v1090_v25 = vsel %vm4418_vm1, %v3019_v47, 0.0  ;;  %v974_v48 = vmul.f32 1.442695, %v935_v10  ;;  %v376_v10 = vld [vmem:[%s2988_s28 + $0x30] sm:$0xff] }
 0x180   : > { %v903_v54 = vpop.xlane.xlu0 %902  ;;  %1797 = vmatpush.msrb.mxu0 %v376_v10  ;;  %v371_v10 = vld [vmem:[%s2988_s28 + $0x8] sm:$0xff] }
 0x181   : > { %v951_v3 = vsub.f32 %v2868_v5, %v903_v54  ;;  %v927_v50 = vpop.xlane.xlu1 %926  ;;  %v990_v54 = vmul.f32 1.442695, %v943_v20 }
 0x182   : > { %v959_v14 = vsub.f32 %v2870_v9, %v927_v50 }
 0x183   : > { %v1006_v41 = vmul.f32 1.442695, %v951_v3  ;;  %v3028_v62 = vpop.eup %2338 }
 0x184   : > { %v1022_v26 = vmul.f32 1.442695, %v959_v14  ;;  %4435 = vst [vmem:[#allocation21_spill] sm:$0xff] %v3028_v62 }
 0x185   : > { %2340 = vpow2.f32 %v1006_v41  ;;  %1043 = vadd.xlane.f32.xlu1 %v1042_v22  ;;  %1091 = vadd.xlane.f32.xlu2 %v1090_v25  ;;  %v1066_v25 = vsel %vm4418_vm1, %v3028_v62, 0.0  ;;  %v375_v22 = vld [vmem:[%s2988_s28 + $0x28] sm:$0xff]  ;;  %v1610_v62 = vmax.f32 %v2709_v59, 0.0 }
 0x186   : > { %2342 = vpow2.f32 %v1022_v26  ;;  %1798 = vmatpush.msrb.mxu0 %v375_v22  ;;  %v374_v26 = vld [vmem:[%s2988_s28 + $0x20] sm:$0xff] }
 0x187   : > { %2344 = vpow2.f32 %v990_v54  ;;  %v384_v54 = vld [vmem:[%s2988_s28 + $0x70] sm:$0xff]  ;;  %v390_v22 = vld [vmem:[%s2988_s28 + $0xa0] sm:$0xff] }
 0x188   : > { %2346 = vpow2.f32 %v974_v48  ;;  %1799 = vmatpush.msrb.mxu0 %v374_v26  ;;  %1862 = vmatpush.msrb.mxu1 %v384_v54  ;;  %v370_v26 = vld [vmem:[%s2988_s28] sm:$0xff]  ;;  %v389_v54 = vld [vmem:[%s2988_s28 + $0x98] sm:$0xff] }
 0x18b   : > { %v3030_v3 = vpop.eup %2340 }
 0x18c   : > { %4436 = vst [vmem:[#allocation22_spill] sm:$0xff] %v3030_v3  ;;  %v1093_v38 = vsel %vm4418_vm1, %v3030_v3, 0.0  ;;  %v3034_v21 = vpop.eup %2342  ;;  %v1609_v3 = vmax.f32 %v2669_v29, 0.0 }
 0x18d   : > { %4437 = vst [vmem:[#allocation23_spill] sm:$0xff] %v3034_v21  ;;  %1094 = vadd.xlane.f32.xlu0 %v1093_v38  ;;  %1067 = vadd.xlane.f32.xlu2 %v1066_v25  ;;  %v1117_v50 = vsel %vm4418_vm1, %v3034_v21, 0.0  ;;  %v3040_v48 = vpop.eup %2344  ;;  %v391_v38 = vld [vmem:[%s2988_s28 + $0xa8] sm:$0xff]  ;;  %v397_v21 = vld [vmem:[%s2988_s28 + $0xd8] sm:$0xff] }
 0x18e   : > { %1118 = vadd.xlane.f32.xlu1 %v1117_v50  ;;  %4438 = vst [vmem:[#allocation24_spill] sm:$0xff] %v3040_v48  ;;  %v3042_v20 = vpop.eup %2346  ;;  %v1069_v41 = vsel %vm4418_vm1, %v3040_v48, 0.0  ;;  %v399_v25 = vld [vmem:[%s2988_s28 + $0xe8] sm:$0xff]  ;;  %1928 = vmatpush.msrb.mxu2 %v391_v38  ;;  %v373_v50 = vld [vmem:[%s2988_s28 + $0x18] sm:$0xff]  ;;  %v382_v48 = vld [vmem:[%s2988_s28 + $0x60] sm:$0xff]  ;;  %v1641_v47 = vmul.f32 %v1609_v3, %v1609_v3  ;;  %v1626_v3 = vmax.f32 %v2711_v60, 0.0 }
 0x18f   : > { %4439 = vst [vmem:[#allocation25_spill] sm:$0xff] %v3042_v20  ;;  %v1045_v14 = vsel %vm4418_vm1, %v3042_v20, 0.0  ;;  %1993 = vmatpush.msrb.mxu3 %v399_v25  ;;  %1800 = vmatpush.msrb.mxu0 %v373_v50  ;;  %v381_v38 = vld [vmem:[%s2988_s28 + $0x58] sm:$0xff]  ;;  %v398_v25 = vld [vmem:[%s2988_s28 + $0xe0] sm:$0xff]  ;;  %v380_v50 = vld [vmem:[%s2988_s28 + $0x50] sm:$0xff]  ;;  %v1624_v20 = vmax.f32 %v2661_v24, 0.0 }
 0x190   : > { %1929 = vmatpush.msrb.mxu2 %v390_v22  ;;  %v379_v22 = vld [vmem:[%s2988_s28 + $0x48] sm:$0xff] }
 0x191   : > { %1994 = vmatpush.msrb.mxu3 %v398_v25  ;;  %v3075_v25 = vstv %s2226_s29  ;;  %v1656_v24 = vmul.f32 %v1624_v20, %v1624_v20 }
 0x192   : > { %1930 = vmatpush.msrb.mxu2 %v389_v54  ;;  %4440 = vst [vmem:[#allocation26_spill] sm:$0xff] %v3075_v25 }
 0x193   : > { %1995 = vmatpush.msrb.mxu3 %v397_v21  ;;  %v3101_v21 = vmul.f32 %v3075_v25, %v1656_v24 }
 0x195   : > { %1070 = vadd.xlane.f32.xlu0 %v1069_v41  ;;  %1046 = vadd.xlane.f32.xlu2 %v1045_v14  ;;  %v372_v41 = vld [vmem:[%s2988_s28 + $0x10] sm:$0xff]  ;;  %v383_v14 = vld [vmem:[%s2988_s28 + $0x68] sm:$0xff] }
 0x196   : > { %1801 = vmatpush.msrb.mxu0 %v372_v41  ;;  %1863 = vmatpush.msrb.mxu1 %v383_v14  ;;  %v388_v41 = vld [vmem:[%s2988_s28 + $0x90] sm:$0xff]  ;;  %v1600_v14 = vmax.f32 %v2637_v6, 0.0  ;;  %v378_v6 = vld [vmem:[%s2988_s28 + $0x40] sm:$0xff] }
 0x197   : > { %1931 = vmatpush.msrb.mxu2 %v388_v41 }
 0x198   : > { %1802 = vmatpush.msrb.mxu0 %v371_v10  ;;  %1864 = vmatpush.msrb.mxu1 %v382_v48  ;;  %v1616_v48 = vmax.f32 %v2652_v17, 0.0  ;;  %v1608_v10 = vmax.f32 %v2644_v12, 0.0  ;;  %v1601_v12 = vmax.f32 %v2688_v43, 0.0 }
 0x19a   : > { %1803 = vmatpush.msrb.mxu0 %v370_v26  ;;  %1865 = vmatpush.msrb.mxu1 %v381_v38  ;;  %v387_v26 = vld [vmem:[%s2988_s28 + $0x88] sm:$0xff]  ;;  %v1632_v38 = vmul.f32 %v1600_v14, %v1600_v14  ;;  %v1648_v41 = vmul.f32 %v1616_v48, %v1616_v48  ;;  %v1640_v17 = vmul.f32 %v1608_v10, %v1608_v10  ;;  %v1602_v14 = vmax.f32 %v2692_v46, 0.0 }
 0x19b   : > { %1932 = vmatpush.msrb.mxu2 %v387_v26  ;;  %v1625_v26 = vmax.f32 %v2690_v45, 0.0  ;;  %v1633_v43 = vmul.f32 %v1601_v12, %v1601_v12 }
 0x19c   : > { %1866 = vmatpush.msrb.mxu1 %v380_v50  ;;  %v386_v50 = vld [vmem:[%s2988_s28 + $0x80] sm:$0xff]  ;;  %v3087_v48 = vmul.f32 %v3075_v25, %v1632_v38  ;;  %v3090_v29 = vmul.f32 %v3075_v25, %v1640_v17  ;;  %v3093_v20 = vmul.f32 %v3075_v25, %v1648_v41  ;;  %v1634_v38 = vmul.f32 %v1602_v14, %v1602_v14 }
 0x19d   : > { %1933 = vmatpush.msrb.mxu2 %v386_v50  ;;  %v1618_v50 = vmax.f32 %v2736_v15, 0.0  ;;  %v1642_v41 = vmul.f32 %v1610_v62, %v1610_v62  ;;  %v1611_v17 = vmax.f32 %v2738_v16, 0.0  ;;  %v3114_v60 = vmul.f32 %v3075_v25, %v1633_v43 }
 0x19e   : > { %1867 = vmatpush.msrb.mxu1 %v379_v22  ;;  %v1617_v22 = vmax.f32 %v2677_v34, 0.0  ;;  %v3117_v15 = vmul.f32 %v3075_v25, %v1641_v47  ;;  %v3128_v43 = vmul.f32 %v3075_v25, %v1634_v38  ;;  %v394_v38 = vld [vmem:[%s2988_s28 + $0xc0] sm:$0xff] }
 0x19f   : > { %v1643_v47 = vmul.f32 %v1611_v17, %v1611_v17 }
 0x1a0   : > { %1868 = vmatpush.msrb.mxu1 %v378_v6  ;;  %v1649_v34 = vmul.f32 %v1617_v22, %v1617_v22  ;;  %v1657_v6 = vmul.f32 %v1625_v26, %v1625_v26  ;;  %v1603_v22 = vmax.f32 %v2757_v32, 0.0  ;;  %v396_v26 = vld [vmem:[%s2988_s28 + $0xd0] sm:$0xff]  ;;  %v1650_v32 = vmul.f32 %v1618_v50, %v1618_v50 }
 0x1a1   : > { %1996 = vmatpush.msrb.mxu3 %v396_v26  ;;  %v1619_v26 = vmax.f32 %v2762_v36, 0.0 }
 0x1a2   : > { %v3121_v14 = vmul.f32 %v3075_v25, %v1649_v34  ;;  %v3125_v53 = vmul.f32 %v3075_v25, %v1657_v6  ;;  %v1635_v50 = vmul.f32 %v1603_v22, %v1603_v22 }
 0x1a3   : > { %1997 = vmatpush.msrb.mxu3 %v395_v0 }
 0x1a5   : > { %1998 = vmatpush.msrb.mxu3 %v394_v38 }
 0x1a9   : > { %v3072_v54 = vpop.xlane.xlu2 %1025 }
 0x1aa   : > { %2348 = vrcp.f32 %v3072_v54  ;;  %v1131_v24 = vand.u32 2147483648, %v3072_v54  ;;  %v1129_v16 = vand.u32 2147483647, %v3072_v54  ;;  %vm1125_vm3 = vweird.f32 %v3072_v54 }
 0x1ac   : > { %v1132_v6 = vor.u32 1.1754944e-38, %v1131_v24  ;;  %vm1130_vm5 = vcmp.eq.f32.partialorder %v1129_v16, 8.507059e+37  ;;  %v3152_v24 = vmul.f32 %v3075_v25, %v1650_v32 }
 0x1ae   : > { %4442 = vst [vmem:[#allocation28_spill] sm:$0xff] %v3152_v24 }
 0x1b0   : > { %v2349_v10 = vpop.eup %2348 }
 0x1b1   : > { %v1121_v45 = vmul.f32 %v2349_v10, %v3072_v54  ;;  %v3096_v46 = vpop.xlane.xlu2 %1073  ;;  %v3098_v59 = vpop.xlane.xlu0 %1049  ;;  %vm1126_vm2 = vweird.f32 %v2349_v10  ;;  %v1604_v54 = vmax.f32 %v2789_v56, 0.0 }
 0x1b2   : > { %2350 = vrcp.f32 %v3096_v46  ;;  %vm1127_vm4 = vmor %vm1125_vm3, %vm1126_vm2  ;;  %vm1365_vm7 = vweird.f32 %v3096_v46  ;;  %v1371_v19 = vand.u32 2147483648, %v3096_v46  ;;  %vm1245_vm10 = vweird.f32 %v3098_v59 }
 0x1b3   : > { %v1122_v12 = vsub.f32 1.0, %v1121_v45  ;;  %2352 = vrcp.f32 %v3098_v59  ;;  %v1658_v45 = vmul.f32 %v1626_v3, %v1626_v3  ;;  %v1627_v3 = vmax.f32 %v2725_v4, 0.0 }
 0x1b4   : > { %v3166_v32 = vmul.f32 %v1604_v54, %v1604_v54 }
 0x1b5   : > { %v1123_v62 = vmul.f32 %v2349_v10, %v1122_v12  ;;  %v3132_v12 = vmul.f32 %v3075_v25, %v1642_v41  ;;  %v3155_v18 = vmul.f32 %v3075_v25, %v1658_v45  ;;  %v1659_v16 = vmul.f32 %v1627_v3, %v1627_v3 }
 0x1b7   : > { %v1124_v39 = vadd.f32 %v2349_v10, %v1123_v62  ;;  %4441 = vst [vmem:[#allocation27_spill] sm:$0xff] %v3132_v12 }
 0x1b8   : > { %v3134_v34 = vpop.eup %2350  ;;  %v3149_v22 = vpop.xlane.xlu1 %1076  ;;  %4443 = vst [vmem:[#allocation29_spill] sm:$0xff] %v3155_v18 }
 0x1b9   : > { %v3140_v17 = vpop.eup %2352  ;;  %v1128_v0 = vsel %vm1127_vm4, %v2349_v10, %v1124_v39  ;;  %v1361_v41 = vmul.f32 %v3134_v34, %v3096_v46  ;;  %v3145_v62 = vpop.xlane.xlu0 %1097  ;;  %v3159_v39 = vstv %s3108_s30  ;;  %v3162_v10 = vmul.f32 %v3075_v25, %v1643_v47 }
 0x1ba   : > { %v1133_v4 = vsel %vm1130_vm5, %v1132_v6, %v1128_v0  ;;  %v1241_v36 = vmul.f32 %v3140_v17, %v3098_v59  ;;  %2354 = vrcp.f32 %v3145_v62  ;;  %v1651_v6 = vmul.f32 %v1619_v26, %v1619_v26 }
 0x1bb   : > { %v1362_v56 = vsub.f32 1.0, %v1361_v41  ;;  %4444 = vst [vmem:[#allocation30_spill] sm:$0xff] %v3162_v10  ;;  %v1134_v0 = vmul.f32 %v2879_v27, %v1133_v4  ;;  %2356 = vrcp.f32 %v3149_v22  ;;  %v1620_v41 = vmax.f32 %v2764_v37, 0.0 }
 0x1bc   : > { %v1242_v38 = vsub.f32 1.0, %v1241_v36  ;;  %vm1366_vm6 = vweird.f32 %v3134_v34  ;;  %v1628_v26 = vmax.f32 %v2781_v51, 0.0  ;;  %vm1246_vm8 = vweird.f32 %v3140_v17 }
 0x1bd   : > { %v1363_v45 = vmul.f32 %v3134_v34, %v1362_v56  ;;  %v1666_v3 = vmul.f32 %v3159_v39, %v1134_v0  ;;  %v1251_v37 = vand.u32 2147483648, %v3098_v59  ;;  %vm3186_vm9 = vmor %vm1365_vm7, %vm1366_vm6  ;;  %v1249_v0 = vand.u32 2147483647, %v3098_v59 }
 0x1be   : > { %v1243_v47 = vmul.f32 %v3140_v17, %v1242_v38  ;;  %v1369_v38 = vand.u32 2147483647, %v3096_v46  ;;  %vm3194_vm11 = vmor %vm1245_vm10, %vm1246_vm8  ;;  %v3205_v46 = vmul.f32 %v3075_v25, %v1659_v16  ;;  %v1605_v59 = vmax.f32 %v2791_v57, 0.0 }
 0x1bf   : > { %v1364_v27 = vadd.f32 %v3134_v34, %v1363_v45  ;;  %v1732_v36 = vadd.f32 %v3087_v48, %v1666_v3  ;;  %v1644_v45 = vmul.f32 %v1612_v23, %v1612_v23  ;;  %v3202_v3 = vmul.f32 %v3075_v25, %v1635_v50 }
 0x1c0   : > { %v1244_v54 = vadd.f32 %v3140_v17, %v1243_v47  ;;  %v3181_v4 = vpop.xlane.xlu2 %1028  ;;  %v3184_v56 = vpop.eup %2354  ;;  %4450 = vst [vmem:[#allocation32_spill] sm:$0xff] %v3205_v46  ;;  %v1613_v23 = vmax.f32 %v2805_v7, 0.0  ;;  %v1621_v50 = vmax.f32 %v2831_v33, 0.0  ;;  %v1252_v24 = vor.u32 1.1754944e-38, %v1251_v37 }
 0x1c1   : > { %2358 = vrcp.f32 %v3181_v4  ;;  %v1481_v48 = vmul.f32 %v3184_v56, %v3145_v62  ;;  %2227 = vmatmul.msk.f32.vlgmr.msrb.gmra.mxu0 %vm4418_vm1, %v1732_v36  ;;  %4449 = vst [vmem:[#allocation31_spill] sm:$0xff] %v3202_v3  ;;  %v3207_v10 = vpop.eup %2356  ;;  %v1368_v18 = vsel %vm3186_vm9, %v3134_v34, %v1364_v27  ;;  %v1372_v3 = vor.u32 1.1754944e-38, %v1371_v19  ;;  %v3218_v57 = vpop.xlane.xlu0 %1052 }
 0x1c2   : > { %v1248_v36 = vsel %vm3194_vm11, %v3140_v17, %v1244_v54  ;;  %v1652_v46 = vmul.f32 %v1620_v41, %v1620_v41  ;;  %v1660_v12 = vmul.f32 %v1628_v26, %v1628_v26  ;;  %vm1370_vm12 = vcmp.eq.f32.partialorder %v1369_v38, 8.507059e+37 }
 0x1c3   : > { %v1482_v16 = vsub.f32 1.0, %v1481_v48  ;;  %vm1250_vm13 = vcmp.eq.f32.partialorder %v1249_v0, 8.507059e+37  ;;  %v1629_v7 = vmax.f32 %v2807_v8, 0.0  ;;  %v1373_v30 = vsel %vm1370_vm12, %v1372_v3, %v1368_v18 }
 0x1c4   : > { %v1253_v51 = vsel %vm1250_vm13, %v1252_v24, %v1248_v36  ;;  %v1376_v34 = vmul.f32 %v3207_v10, %v3149_v22  ;;  %v1637_v17 = vmul.f32 %v1605_v59, %v1605_v59  ;;  %v3225_v33 = vmul.f32 %v1613_v23, %v1613_v23 }
 0x1c5   : > { %v1606_v19 = vmax.f32 %v2812_v13, 0.0  ;;  %v1614_v41 = vmax.f32 %v2855_v55, 0.0  ;;  %v3229_v26 = vmul.f32 %v1621_v50, %v1621_v50  ;;  %v1483_v54 = vmul.f32 %v3184_v56, %v1482_v16 }
 0x1c6   : > { %v3235_v8 = vmul.f32 %v3075_v25, %v1644_v45  ;;  %v3238_v18 = vmul.f32 %v3075_v25, %v1651_v6  ;;  %2360 = vrcp.f32 %v3218_v57  ;;  %v1254_v13 = vmul.f32 %v2887_v49, %v1253_v51 }
 0x1c7   : > { %v3223_v27 = vpop.eup %2358  ;;  %v1374_v55 = vmul.f32 %v2885_v44, %v1373_v30  ;;  %v3245_v38 = vmul.f32 %v1629_v7, %v1629_v7  ;;  %v1622_v0 = vmax.f32 %v2826_v28, 0.0  ;;  %v1630_v47 = vmax.f32 %v2833_v35, 0.0 }
 0x1c8   : > { %v3232_v37 = vpop.xlane.xlu2 %1100  ;;  %v1136_v24 = vmul.f32 %v3223_v27, %v3181_v4  ;;  %v1377_v45 = vsub.f32 1.0, %v1376_v34  ;;  %v3249_v48 = vmul.f32 %v1606_v19, %v1606_v19  ;;  %v3251_v6 = vmul.f32 %v1614_v41, %v1614_v41  ;;  %v3263_v30 = vpop.xlane.xlu1 %1055 }
 0x1c9   : > { %v1607_v3 = vmax.f32 %v2850_v52, 0.0  ;;  %v3256_v59 = vmul.f32 %v3075_v25, %v3166_v32  ;;  %v1484_v49 = vadd.f32 %v3184_v56, %v1483_v54  ;;  %vm1486_vm14 = vweird.f32 %v3184_v56  ;;  %v3284_v54 = vpop.xlane.xlu0 %1031 }
 0x1ca   : > { %v1489_v44 = vand.u32 2147483647, %v3145_v62  ;;  %v1491_v28 = vand.u32 2147483648, %v3145_v62  ;;  %v1137_v35 = vsub.f32 1.0, %v1136_v24  ;;  %2362 = vrcp.f32 %v3232_v37 }
 0x1cb   : > { %v1674_v23 = vmul.f32 %v3159_v39, %v1254_v13  ;;  %v1682_v52 = vmul.f32 %v3159_v39, %v1374_v55  ;;  %v1654_v36 = vmul.f32 %v1622_v0, %v1622_v0  ;;  %v3267_v32 = vmul.f32 %v1630_v47, %v1630_v47 }
 0x1cc   : > { %v1378_v50 = vmul.f32 %v3207_v10, %v1377_v45  ;;  %vm1485_vm15 = vweird.f32 %v3145_v62  ;;  %v3271_v16 = vpop.eup %2360  ;;  %v3273_v7 = vmul.f32 %v1607_v3, %v1607_v3  ;;  %v1623_v34 = vmax.f32 %v2868_v5, 0.0 }
 0x1cd   : > { %vm3279_vm2 = vmor %vm1485_vm15, %vm1486_vm14  ;;  %v1740_v41 = vadd.f32 %v3090_v29, %v1674_v23  ;;  %v1748_v24 = vadd.f32 %v3093_v20, %v1682_v52  ;;  %v3291_v13 = vmul.f32 %v3075_v25, %v1660_v12  ;;  %v3294_v5 = vmul.f32 %v3075_v25, %v1652_v46 }
 0x1ce   : > { %4451 = vst [vmem:[#allocation33_spill] sm:$0xff] %v3273_v7  ;;  %v1488_v62 = vsel %vm3279_vm2, %v3184_v56, %v1484_v49  ;;  %vm1490_vm3 = vcmp.eq.f32.partialorder %v1489_v44, 8.507059e+37  ;;  %v1492_v0 = vor.u32 1.1754944e-38, %v1491_v28  ;;  %v1138_v29 = vmul.f32 %v3223_v27, %v1137_v35 }
 0x1cf   : > { %2235 = vmatmul.msk.f32.vlgmr.msrb.gmra.mxu1 %vm4418_vm1, %v1740_v41  ;;  %v1379_v47 = vadd.f32 %v3207_v10, %v1378_v50  ;;  %vm1381_vm4 = vweird.f32 %v3207_v10  ;;  %v1256_v20 = vmul.f32 %v3271_v16, %v3218_v57  ;;  %2243 = vmatmul.msk.f32.vlgmr.msrb.gmra.mxu2 %vm4418_vm1, %v1748_v24  ;;  %2364 = vrcp.f32 %v3284_v54 }
 0x1d0   : > { %v3305_v12 = vpop.xlane.xlu2 %1103  ;;  %v3307_v56 = vpop.eup %2362  ;;  %v3309_v46 = vmul.f32 %v1623_v34, %v1623_v34  ;;  %v1386_v45 = vand.u32 2147483648, %v3149_v22  ;;  %v1493_v3 = vsel %vm1490_vm3, %v1492_v0, %v1488_v62  ;;  %v3313_v49 = vmul.f32 %v3075_v25, %v1637_v17 }
 0x1d1   : > { %vm1380_vm5 = vweird.f32 %v3149_v22  ;;  %v1384_v44 = vand.u32 2147483647, %v3149_v22  ;;  %v1144_v28 = vand.u32 2147483647, %v3181_v4  ;;  %v3320_v35 = vmul.f32 %v3075_v25, %v3225_v33  ;;  %v3337_v41 = vpop.xlane.xlu1 %1079 }
 0x1d2   : > { %4454 = vst [vmem:[#allocation34_spill] sm:$0xff] %v3309_v46  ;;  %vm3322_vm6 = vmor %vm1380_vm5, %vm1381_vm4  ;;  %v1139_v52 = vadd.f32 %v3223_v27, %v1138_v29  ;;  %vm1141_vm7 = vweird.f32 %v3223_v27  ;;  %v1146_v17 = vand.u32 2147483648, %v3181_v4  ;;  %2366 = vrcp.f32 %v3263_v30 }
 0x1d3   : > { %v1257_v50 = vsub.f32 1.0, %v1256_v20  ;;  %v1496_v22 = vmul.f32 %v3307_v56, %v3232_v37  ;;  %v1494_v34 = vmul.f32 %v2898_v11, %v1493_v3  ;;  %v1383_v33 = vsel %vm3322_vm6, %v3207_v10, %v1379_v47 }
 0x1d4   : > { %v1387_v19 = vor.u32 1.1754944e-38, %v1386_v45  ;;  %vm1140_vm8 = vweird.f32 %v3181_v4  ;;  %v3341_v62 = vmul.f32 %v3075_v25, %v3229_v26  ;;  %v3345_v24 = vmul.f32 %v3075_v25, %v3245_v38 }
 0x1d5   : > { %v3347_v0 = vpop.eup %2364  ;;  %vm1385_vm9 = vcmp.eq.f32.partialorder %v1384_v44, 8.507059e+37  ;;  %vm3349_vm10 = vmor %vm1140_vm8, %vm1141_vm7  ;;  %v1690_v10 = vmul.f32 %v3159_v39, %v1494_v34  ;;  %v3356_v4 = vmul.f32 %v3075_v25, %v3249_v48  ;;  %v3359_v26 = vmul.f32 %v3075_v25, %v1654_v36  ;;  %v3372_v44 = vpop.xlane.xlu0 %1106 }
 0x1d6   : > { %v1147_v29 = vor.u32 1.1754944e-38, %v1146_v17  ;;  %2368 = vrcp.f32 %v3305_v12  ;;  %v1388_v38 = vsel %vm1385_vm9, %v1387_v19, %v1383_v33  ;;  %v1143_v47 = vsel %vm3349_vm10, %v3223_v27, %v1139_v52 }
 0x1d7   : > { %vm1145_vm11 = vcmp.eq.f32.partialorder %v1144_v28, 8.507059e+37  ;;  %v1258_v20 = vmul.f32 %v3271_v16, %v1257_v50  ;;  %v1497_v45 = vsub.f32 1.0, %v1496_v22  ;;  %2370 = vrcp.f32 %v3337_v41 }
 0x1d8   : > { %v3367_v3 = vpop.eup %2366  ;;  %v1151_v48 = vmul.f32 %v3347_v0, %v3284_v54  ;;  %v1756_v36 = vadd.f32 %v3101_v21, %v1690_v10  ;;  %v1389_v23 = vmul.f32 %v2895_v2, %v1388_v38  ;;  %v1148_v17 = vsel %vm1145_vm11, %v1147_v29, %v1143_v47  ;;  %v3377_v52 = vpop.xlane.xlu2 %1058 }
 0x1d9   : > { %v1264_v27 = vand.u32 2147483647, %v3218_v57  ;;  %v1149_v28 = vmul.f32 %v2909_v40, %v1148_v17  ;;  %v3381_v50 = vmul.f32 %v3075_v25, %v3267_v32  ;;  %v3385_v22 = vmul.f32 %v3075_v25, %v3251_v6 }
 0x1da   : > { %v1266_v21 = vand.u32 2147483648, %v3218_v57  ;;  %v1504_v34 = vand.u32 2147483647, %v3232_v37  ;;  %v1506_v2 = vand.u32 2147483648, %v3232_v37  ;;  %2251 = vmatmul.msk.f32.vlgmr.msrb.gmra.mxu3 %vm4418_vm1, %v1756_v36  ;;  %v1683_v40 = vmul.f32 %v3159_v39, %v1389_v23 }
 0x1db   : > { %4459 = vst [vmem:[#allocation35_spill] sm:$0xff] %v3381_v50  ;;  %v1259_v33 = vadd.f32 %v3271_v16, %v1258_v20  ;;  %vm1261_vm12 = vweird.f32 %v3271_v16  ;;  %v1271_v32 = vmul.f32 %v3367_v3, %v3263_v30  ;;  %v1667_v6 = vmul.f32 %v3159_v39, %v1149_v28 }
 0x1dc   : > { %4460 = vst [vmem:[#allocation36_spill] sm:$0xff] %v3385_v22  ;;  %v3397_v19 = vpop.eup %2368  ;;  %v1498_v11 = vmul.f32 %v3307_v56, %v1497_v45  ;;  %v1281_v10 = vand.u32 2147483648, %v3263_v30  ;;  %v1152_v29 = vsub.f32 1.0, %v1151_v48  ;;  %v1749_v38 = vadd.f32 %v3121_v14, %v1683_v40 }
 0x1dd   : > { %v3402_v47 = vpop.eup %2370  ;;  %vm1260_vm13 = vweird.f32 %v3218_v57  ;;  %vm3405_vm14 = vcmp.eq.f32.partialorder %v1264_v27, 8.507059e+37  ;;  %2372 = vrcp.f32 %v3372_v44  ;;  %v1733_v36 = vadd.f32 %v3114_v60, %v1667_v6  ;;  %v3419_v57 = vpop.xlane.xlu1 %1034 }
 0x1de   : > { %vm3411_vm15 = vmor %vm1260_vm13, %vm1261_vm12  ;;  %v1267_v45 = vor.u32 1.1754944e-38, %v1266_v21  ;;  %vm1500_vm2 = vweird.f32 %v3232_v37  ;;  %v1279_v14 = vand.u32 2147483647, %v3263_v30  ;;  %v1159_v48 = vand.u32 2147483647, %v3284_v54  ;;  %2244 = vmatmul.msk.f32.gmra.mxu2 %vm4418_vm1, %v1749_v38 }
 0x1df   : > { %vm3421_vm3 = vcmp.eq.f32.partialorder %v1504_v34, 8.507059e+37  ;;  %v1507_v60 = vor.u32 1.1754944e-38, %v1506_v2  ;;  %v1272_v27 = vsub.f32 1.0, %v1271_v32  ;;  %2228 = vmatmul.msk.f32.gmra.mxu0 %vm4418_vm1, %v1733_v36  ;;  %v1263_v28 = vsel %vm3411_vm15, %v3271_v16, %v1259_v33 }
 0x1e0   : > { %v1499_v21 = vadd.f32 %v3307_v56, %v1498_v11  ;;  %vm1501_vm4 = vweird.f32 %v3307_v56  ;;  %v3431_v40 = vor.u32 1.1754944e-38, %v1281_v10  ;;  %v1153_v6 = vmul.f32 %v3347_v0, %v1152_v29  ;;  %v3448_v11 = vpop.xlane.xlu0 %1061  ;;  %v3458_v36 = vpop.xlane.xlu2 %1082 }
 0x1e1   : > { %v1511_v34 = vmul.f32 %v3397_v19, %v3305_v12  ;;  %v1391_v2 = vmul.f32 %v3402_v47, %v3337_v41  ;;  %2374 = vrcp.f32 %v3377_v52  ;;  %v1268_v32 = vsel %vm3405_vm14, %v1267_v45, %v1263_v28  ;;  %vm1502_vm8 = vmor %vm1500_vm2, %vm1501_vm4 }
 0x1e2   : > { %vm1276_vm5 = vweird.f32 %v3367_v3  ;;  %vm1155_vm6 = vweird.f32 %v3284_v54  ;;  %vm3443_vm7 = vcmp.eq.f32.partialorder %v1159_v48, 8.507059e+37  ;;  %v1269_v33 = vmul.f32 %v2906_v31, %v1268_v32 }
 0x1e3   : > { %v3450_v10 = vpop.eup %2372  ;;  %v1273_v29 = vmul.f32 %v3367_v3, %v1272_v27  ;;  %v1161_v38 = vand.u32 2147483648, %v3284_v54  ;;  %v1521_v20 = vand.u32 2147483648, %v3305_v12  ;;  %2376 = vrcp.f32 %v3419_v57 }
 0x1e4   : > { %vm1275_vm9 = vweird.f32 %v3263_v30  ;;  %v1154_v31 = vadd.f32 %v3347_v0, %v1153_v6  ;;  %vm1156_vm10 = vweird.f32 %v3347_v0  ;;  %v1675_v23 = vmul.f32 %v3159_v39, %v1269_v33 }
 0x1e5   : > { %v1503_v37 = vsel %vm1502_vm8, %v3307_v56, %v1499_v21  ;;  %v1512_v45 = vsub.f32 1.0, %v1511_v34  ;;  %v1519_v48 = vand.u32 2147483647, %v3305_v12  ;;  %v1392_v27 = vsub.f32 1.0, %v1391_v2  ;;  %vm3482_vm13 = vmor %vm1155_vm6, %vm1156_vm10  ;;  %v3494_v54 = vpop.xlane.xlu1 %1109 }
 0x1e6   : > { %v1508_v28 = vsel %vm3421_vm3, %v1507_v60, %v1503_v37  ;;  %vm1515_vm11 = vweird.f32 %v3305_v12  ;;  %v1399_v32 = vand.u32 2147483647, %v3337_v41  ;;  %v1526_v6 = vmul.f32 %v3450_v10, %v3372_v44  ;;  %vm3535_vm6 = vmor %vm1275_vm9, %vm1276_vm5 }
 0x1e7   : > { %v1741_v55 = vadd.f32 %v3117_v15, %v1675_v23  ;;  %2378 = vrcp.f32 %v3448_v11  ;;  %v3474_v33 = vpop.eup %2374  ;;  %vm3476_vm12 = vcmp.eq.f32.partialorder %v1279_v14, 8.507059e+37  ;;  %v1162_v60 = vor.u32 1.1754944e-38, %v1161_v38 }
 0x1e8   : > { %vm1395_vm14 = vweird.f32 %v3337_v41  ;;  %v1401_v21 = vand.u32 2147483648, %v3337_v41  ;;  %v1509_v15 = vmul.f32 %v2916_v61, %v1508_v28  ;;  %v1274_v34 = vadd.f32 %v3367_v3, %v1273_v29  ;;  %v3529_v16 = vpop.xlane.xlu0 %1085 }
 0x1e9   : > { %v3490_v2 = vor.u32 1.1754944e-38, %v1521_v20  ;;  %v1536_v14 = vand.u32 2147483648, %v3372_v44  ;;  %2236 = vmatmul.msk.f32.gmra.mxu1 %vm4418_vm1, %v1741_v55  ;;  %v1158_v38 = vsel %vm3482_vm13, %v3347_v0, %v1154_v31  ;;  %v3499_v23 = vpop.eup %2376  ;;  %v1513_v37 = vmul.f32 %v3397_v19, %v1512_v45 }
 0x1ea   : > { %v1393_v61 = vmul.f32 %v3402_v47, %v1392_v27  ;;  %2380 = vrcp.f32 %v3458_v36  ;;  %v1691_v29 = vmul.f32 %v3159_v39, %v1509_v15  ;;  %vm3505_vm15 = vcmp.eq.f32.partialorder %v1519_v48, 8.507059e+37 }
 0x1eb   : > { %vm3509_vm2 = vcmp.eq.f32.partialorder %v1399_v32, 8.507059e+37  ;;  %v1527_v28 = vsub.f32 1.0, %v1526_v6  ;;  %v1286_v0 = vmul.f32 %v3474_v33, %v3377_v52  ;;  %v1296_v31 = vand.u32 2147483648, %v3377_v52 }
 0x1ec   : > { %v1163_v45 = vsel %vm3443_vm7, %v1162_v60, %v1158_v38  ;;  %v1402_v27 = vor.u32 1.1754944e-38, %v1401_v21  ;;  %v1757_v48 = vadd.f32 %v3125_v53, %v1691_v29  ;;  %vm1516_vm3 = vweird.f32 %v3397_v19  ;;  %v3544_v38 = vpop.xlane.xlu2 %1037 }
 0x1ed   : > { %v1164_v15 = vmul.f32 %v2919_v63, %v1163_v45  ;;  %v3521_v32 = vpop.eup %2378  ;;  %vm1396_vm4 = vweird.f32 %v3402_v47  ;;  %v3525_v6 = vor.u32 1.1754944e-38, %v1536_v14  ;;  %v1166_v51 = vmul.f32 %v3499_v23, %v3419_v57  ;;  %vm3558_vm5 = vmor %vm1515_vm11, %vm1516_vm3 }
 0x1ee   : > { %v1514_v63 = vadd.f32 %v3397_v19, %v1513_v37  ;;  %v1394_v60 = vadd.f32 %v3402_v47, %v1393_v61  ;;  %v1294_v21 = vand.u32 2147483647, %v3377_v52  ;;  %2252 = vmatmul.msk.f32.gmra.mxu3 %vm4418_vm1, %v1757_v48  ;;  %v1528_v29 = vmul.f32 %v3450_v10, %v1527_v28  ;;  %vm3571_vm7 = vmor %vm1395_vm14, %vm1396_vm4 }
 0x1ef   : > { %v1668_v14 = vmul.f32 %v3159_v39, %v1164_v15  ;;  %v1287_v45 = vsub.f32 1.0, %v1286_v0  ;;  %v3547_v30 = vor.u32 1.1754944e-38, %v1296_v31  ;;  %v1278_v17 = vsel %vm3535_vm6, %v3367_v3, %v1274_v34 }
 0x1f0   : > { %v3552_v37 = vpop.eup %2380  ;;  %v1174_v48 = vand.u32 2147483647, %v3419_v57  ;;  %v1301_v28 = vmul.f32 %v3521_v32, %v3448_v11  ;;  %2382 = vrcp.f32 %v3494_v54  ;;  %v1167_v12 = vsub.f32 1.0, %v1166_v51 }
 0x1f1   : > { %v1734_v0 = vadd.f32 %v3128_v43, %v1668_v14  ;;  %v1176_v34 = vand.u32 2147483648, %v3419_v57  ;;  %2384 = vrcp.f32 %v3529_v16  ;;  %v1283_v31 = vsel %vm3476_vm12, %v3431_v40, %v1278_v17  ;;  %v3598_v17 = vpop.xlane.xlu1 %1064 }
 0x1f2   : > { %vm1290_vm8 = vweird.f32 %v3377_v52  ;;  %v1284_v43 = vmul.f32 %v2921_v1, %v1283_v31  ;;  %2386 = vrcp.f32 %v3544_v38  ;;  %v1398_v51 = vsel %vm3571_vm7, %v3402_v47, %v1394_v60  ;;  %v3630_v31 = vpop.xlane.xlu0 %1040  ;;  %v4501_v60 = vld [vmem:[#allocation7_spill] sm:$0xff] }
 0x1f3   : > { %2229 = vmatmul.msk.f32.gmra.mxu0 %vm4418_vm1, %v1734_v0  ;;  %v1518_v41 = vsel %vm3558_vm5, %v3397_v19, %v1514_v63  ;;  %v3591_v15 = vadd.f32 %v3450_v10, %v1528_v29  ;;  %v1288_v40 = vmul.f32 %v3474_v33, %v1287_v45  ;;  %vm1170_vm9 = vweird.f32 %v3419_v57  ;;  %v4485_v45 = vld [vmem:[#allocation5_spill] sm:$0xff] }
 0x1f4   : > { %v1406_v1 = vmul.f32 %v3552_v37, %v3458_v36  ;;  %vm1531_vm10 = vweird.f32 %v3450_v10  ;;  %v1302_v47 = vsub.f32 1.0, %v1301_v28  ;;  %v1676_v53 = vmul.f32 %v3159_v39, %v1284_v43 }
 0x1f5   : > { %v1403_v19 = vsel %vm3509_vm2, %v1402_v27, %v1398_v51  ;;  %v1523_v63 = vsel %vm3505_vm15, %v3490_v2, %v1518_v41  ;;  %vm1291_vm11 = vweird.f32 %v3474_v33  ;;  %vm3608_vm12 = vcmp.eq.f32.partialorder %v1294_v21, 8.507059e+37  ;;  %v4488_v27 = vld [vmem:[#allocation27_spill] sm:$0xff] }
 0x1f6   : > { %v1168_v14 = vmul.f32 %v3499_v23, %v1167_v12  ;;  %v1404_v29 = vmul.f32 %v2936_v42, %v1403_v19  ;;  %v1524_v61 = vmul.f32 %v4485_v45, %v1523_v63  ;;  %v3615_v28 = vpop.eup %2382  ;;  %vm1530_vm13 = vweird.f32 %v3372_v44  ;;  %v3645_v19 = vpop.xlane.xlu2 %1112  ;;  %v4492_v45 = vld [vmem:[#allocation28_spill] sm:$0xff]  ;;  %vm3661_vm3 = vmor %vm1290_vm8, %vm1291_vm11 }
 0x1f7   : > { %vm3618_vm14 = vcmp.eq.f32.partialorder %v1174_v48, 8.507059e+37  ;;  %v1311_v2 = vand.u32 2147483648, %v3448_v11  ;;  %v1416_v20 = vand.u32 2147483648, %v3458_v36  ;;  %v1742_v21 = vadd.f32 %v4488_v27, %v1676_v53  ;;  %v3625_v0 = vpop.eup %2384  ;;  %v4493_v27 = vld [vmem:[#allocation29_spill] sm:$0xff]  ;;  %vm3714_vm11 = vmor %vm1530_vm13, %vm1531_vm10 }
 0x1f8   : > { %v1407_v3 = vsub.f32 1.0, %v1406_v1  ;;  %v1684_v42 = vmul.f32 %v3159_v39, %v1404_v29  ;;  %v1692_v12 = vmul.f32 %v3159_v39, %v1524_v61  ;;  %2388 = vrcp.f32 %v3598_v17  ;;  %v3632_v48 = vpop.eup %2386 }
 0x1f9   : > { %v4489_v43 = vand.u32 2147483647, %v3372_v44  ;;  %v1289_v41 = vadd.f32 %v3474_v33, %v1288_v40  ;;  %vm1171_vm2 = vweird.f32 %v3499_v23  ;;  %v1303_v1 = vmul.f32 %v3521_v32, %v1302_v47  ;;  %2237 = vmatmul.msk.f32.gmra.mxu1 %vm4418_vm1, %v1742_v21 }
 0x1fa   : > { %v1551_v53 = vand.u32 2147483648, %v3494_v54  ;;  %v1169_v63 = vadd.f32 %v3499_v23, %v1168_v14  ;;  %v1541_v29 = vmul.f32 %v3615_v28, %v3494_v54  ;;  %v1750_v61 = vadd.f32 %v4492_v45, %v1684_v42  ;;  %vm3678_vm6 = vmor %vm1170_vm9, %vm1171_vm2 }
 0x1fb   : > { %vm3636_vm15 = vcmp.eq.f32.partialorder %v4489_v43, 8.507059e+37  ;;  %v1758_v43 = vadd.f32 %v4493_v27, %v1692_v12  ;;  %v1177_v40 = vor.u32 1.1754944e-38, %v1176_v34  ;;  %v3652_v56 = vor.u32 1.1754944e-38, %v1311_v2 }
 0x1fc   : > { %v1414_v47 = vand.u32 2147483647, %v3458_v36  ;;  %v3655_v7 = vor.u32 1.1754944e-38, %v1416_v20  ;;  %vm1306_vm4 = vweird.f32 %v3521_v32  ;;  %v1408_v21 = vmul.f32 %v3552_v37, %v1407_v3  ;;  %2245 = vmatmul.msk.f32.gmra.mxu2 %vm4418_vm1, %v1750_v61 }
 0x1fd   : > { %v1549_v34 = vand.u32 2147483647, %v3494_v54  ;;  %v1421_v2 = vmul.f32 %v3625_v0, %v3529_v16  ;;  %v1181_v20 = vmul.f32 %v3632_v48, %v3544_v38  ;;  %2253 = vmatmul.msk.f32.gmra.mxu3 %vm4418_vm1, %v1758_v43  ;;  %v3683_v3 = vadd.f32 %v3521_v32, %v1303_v1 }
 0x1fe   : > { %vm1411_vm5 = vweird.f32 %v3552_v37  ;;  %v3686_v42 = vor.u32 1.1754944e-38, %v1551_v53  ;;  %2390 = vrcp.f32 %v3630_v31  ;;  %v3689_v12 = vpop.eup %2388  ;;  %vm1305_vm7 = vweird.f32 %v3448_v11  ;;  %v3700_v53 = vpop.xlane.xlu1 %1088 }
 0x1ff   : > { %v1542_v45 = vsub.f32 1.0, %v1541_v29  ;;  %vm1546_vm8 = vweird.f32 %v3615_v28  ;;  %2392 = vrcp.f32 %v3645_v19  ;;  %v1173_v57 = vsel %vm3678_vm6, %v3499_v23, %v1169_v63  ;;  %v4500_v63 = vld [vmem:[#allocation9_spill] sm:$0xff] }
 0x200   : > { %v1293_v1 = vsel %vm3661_vm3, %v3474_v33, %v1289_v41  ;;  %vm1410_vm9 = vweird.f32 %v3458_v36  ;;  %v1431_v29 = vand.u32 2147483648, %v3529_v16  ;;  %v1178_v27 = vsel %vm3618_vm14, %v1177_v40, %v1173_v57  ;;  %vm3784_vm14 = vmor %vm1305_vm7, %vm1306_vm4 }
 0x201   : > { %v1298_v43 = vsel %vm3608_vm12, %v3547_v30, %v1293_v1  ;;  %v3719_v23 = vadd.f32 %v3552_v37, %v1408_v21  ;;  %vm1545_vm2 = vweird.f32 %v3494_v54  ;;  %v1422_v41 = vsub.f32 1.0, %v1421_v2 }
 0x202   : > { %v1182_v55 = vsub.f32 1.0, %v1181_v20  ;;  %v1179_v40 = vmul.f32 %v4500_v63, %v1178_v27  ;;  %v1316_v30 = vmul.f32 %v3689_v12, %v3598_v17  ;;  %v1299_v14 = vmul.f32 %v4501_v60, %v1298_v43  ;;  %v4507_v63 = vld [vmem:[#allocation6_spill] sm:$0xff]  ;;  %v3756_v60 = vpop.xlane.xlu2 %1091  ;;  %vm3815_vm4 = vmor %vm1545_vm2, %vm1546_vm8 }
 0x203   : > { %v1533_v44 = vsel %vm3714_vm11, %v3450_v10, %v3591_v15  ;;  %2394 = vrcp.f32 %v3700_v53  ;;  %v4502_v21 = vand.u32 2147483647, %v3448_v11  ;;  %vm3737_vm12 = vcmp.eq.f32.partialorder %v1414_v47, 8.507059e+37  ;;  %v3747_v15 = vpop.xlane.xlu0 %1115 }
 0x204   : > { %v1543_v20 = vmul.f32 %v3615_v28, %v1542_v45  ;;  %v1191_v57 = vand.u32 2147483648, %v3544_v38  ;;  %v1669_v1 = vmul.f32 %v3159_v39, %v1179_v40  ;;  %v1538_v10 = vsel %vm3636_vm15, %v3525_v6, %v1533_v44  ;;  %v3749_v27 = vpop.eup %2390  ;;  %v4510_v44 = vld [vmem:[#allocation31_spill] sm:$0xff]  ;;  %vm3798_vm15 = vmor %vm1410_vm9, %vm1411_vm5 }
 0x205   : > { %vm3733_vm10 = vcmp.eq.f32.partialorder %v4502_v21, 8.507059e+37  ;;  %v3751_v43 = vor.u32 1.1754944e-38, %v1431_v29  ;;  %v1677_v33 = vmul.f32 %v3159_v39, %v1299_v14  ;;  %v1539_v45 = vmul.f32 %v4507_v63, %v1538_v10  ;;  %v3758_v21 = vpop.eup %2392  ;;  %v4511_v14 = vld [vmem:[#allocation30_spill] sm:$0xff] }
 0x206   : > { %vm3760_vm13 = vcmp.eq.f32.partialorder %v1549_v34, 8.507059e+37  ;;  %v1423_v6 = vmul.f32 %v3625_v0, %v1422_v41  ;;  %v1183_v51 = vmul.f32 %v3632_v48, %v1182_v55  ;;  %v1326_v29 = vand.u32 2147483648, %v3598_v17 }
 0x207   : > { %v1735_v47 = vadd.f32 %v4510_v44, %v1669_v1  ;;  %v1317_v61 = vsub.f32 1.0, %v1316_v30  ;;  %v1743_v25 = vadd.f32 %v4511_v14, %v1677_v33  ;;  %v1693_v10 = vmul.f32 %v3159_v39, %v1539_v45  ;;  %v4514_v1 = vld [vmem:[#allocation32_spill] sm:$0xff] }
 0x208   : > { %2396 = vrcp.f32 %v3747_v15  ;;  %v1544_v34 = vadd.f32 %v3615_v28, %v1543_v20  ;;  %v3772_v63 = vor.u32 1.1754944e-38, %v1191_v57  ;;  %v1324_v46 = vand.u32 2147483647, %v3598_v17 }
 0x209   : > { %v1196_v41 = vmul.f32 %v3749_v27, %v3630_v31  ;;  %2230 = vmatmul.msk.f32.gmra.mxu0 %vm4418_vm1, %v1735_v47  ;;  %v3778_v55 = vpop.eup %2394  ;;  %v1206_v20 = vand.u32 2147483648, %v3630_v31  ;;  %v1556_v57 = vmul.f32 %v3758_v21, %v3645_v19  ;;  %2238 = vmatmul.msk.f32.gmra.mxu1 %vm4418_vm1, %v1743_v25  ;;  %v1759_v33 = vadd.f32 %v4514_v1, %v1693_v10 }
 0x20a   : > { %2398 = vrcp.f32 %v3756_v60  ;;  %v3803_v47 = vadd.f32 %v3625_v0, %v1423_v6  ;;  %vm1426_vm3 = vweird.f32 %v3625_v0  ;;  %v3806_v45 = vor.u32 1.1754944e-38, %v1326_v29  ;;  %v3869_v2 = vpop.xlane.xlu2 %1067 }
 0x20b   : > { %v1566_v25 = vand.u32 2147483648, %v3645_v19  ;;  %v1436_v44 = vmul.f32 %v3778_v55, %v3700_v53  ;;  %v3820_v6 = vadd.f32 %v3632_v48, %v1183_v51  ;;  %vm1186_vm6 = vweird.f32 %v3632_v48  ;;  %2254 = vmatmul.msk.f32.gmra.mxu3 %vm4418_vm1, %v1759_v33  ;;  %v3840_v33 = vpop.xlane.xlu1 %1043 }
 0x20c   : > { %v1318_v29 = vmul.f32 %v3689_v12, %v1317_v61  ;;  %vm1425_vm5 = vweird.f32 %v3529_v16  ;;  %vm1321_vm7 = vweird.f32 %v3689_v12  ;;  %v1197_v54 = vsub.f32 1.0, %v1196_v41 }
 0x20d   : > { %v1308_v51 = vsel %vm3784_vm14, %v3521_v32, %v3683_v3  ;;  %v1413_v61 = vsel %vm3798_vm15, %v3552_v37, %v3719_v23  ;;  %v1548_v1 = vsel %vm3815_vm4, %v3615_v28, %v1544_v34  ;;  %vm1185_vm8 = vweird.f32 %v3544_v38  ;;  %v4519_v34 = vld [vmem:[#allocation8_spill] sm:$0xff] }
 0x20e   : > { %v3842_v10 = vpop.eup %2396  ;;  %v3845_v41 = vor.u32 1.1754944e-38, %v1206_v20  ;;  %v1557_v14 = vsub.f32 1.0, %v1556_v57  ;;  %v1313_v32 = vsel %vm3733_vm10, %v3652_v56, %v1308_v51  ;;  %v1418_v37 = vsel %vm3737_vm12, %v3655_v7, %v1413_v61  ;;  %v4520_v56 = vld [vmem:[#allocation10_spill] sm:$0xff]  ;;  %vm3917_vm12 = vmor %vm1425_vm5, %vm1426_vm3 }
 0x20f   : > { %vm1320_vm9 = vweird.f32 %v3598_v17  ;;  %v3854_v28 = vor.u32 1.1754944e-38, %v1566_v25  ;;  %v1437_v3 = vsub.f32 1.0, %v1436_v44  ;;  %v1571_v23 = vmul.f32 %v3842_v10, %v3747_v15 }
 0x210   : > { %v1314_v30 = vmul.f32 %v4519_v34, %v1313_v32  ;;  %v3859_v20 = vpop.eup %2398  ;;  %v3862_v57 = vadd.f32 %v3689_v12, %v1318_v29  ;;  %v1419_v52 = vmul.f32 %v4520_v56, %v1418_v37  ;;  %v1553_v7 = vsel %vm3760_vm13, %v3686_v42, %v1548_v1  ;;  %v4529_v37 = vld [vmem:[#allocation12_spill] sm:$0xff]  ;;  %vm3931_vm13 = vmor %vm1185_vm8, %vm1186_vm6 }
 0x211   : > { %2400 = vrcp.f32 %v3840_v33  ;;  %v1198_v11 = vmul.f32 %v3749_v27, %v1197_v54  ;;  %v1446_v25 = vand.u32 2147483648, %v3700_v53  ;;  %v1572_v44 = vsub.f32 1.0, %v1571_v23  ;;  %vm3947_vm14 = vmor %vm1320_vm9, %vm1321_vm7  ;;  %v4567_v54 = vld [vmem:[#allocation14_spill] sm:$0xff] }
 0x212   : > { %v1451_v36 = vmul.f32 %v3859_v20, %v3756_v60  ;;  %v4521_v29 = vand.u32 2147483647, %v3529_v16  ;;  %v4524_v42 = vand.u32 2147483647, %v3544_v38  ;;  %vm3887_vm10 = vcmp.eq.f32.partialorder %v1324_v46, 8.507059e+37  ;;  %v3899_v46 = vpop.xlane.xlu0 %1094 }
 0x213   : > { %v1558_v61 = vmul.f32 %v3758_v21, %v1557_v14  ;;  %v1678_v1 = vmul.f32 %v3159_v39, %v1314_v30  ;;  %v1685_v32 = vmul.f32 %v3159_v39, %v1419_v52  ;;  %v1554_v23 = vmul.f32 %v4529_v37, %v1553_v7 }
 0x214   : > { %vm3877_vm11 = vcmp.eq.f32.partialorder %v4521_v29, 8.507059e+37  ;;  %vm3883_vm2 = vcmp.eq.f32.partialorder %v4524_v42, 8.507059e+37  ;;  %v1438_v34 = vmul.f32 %v3778_v55, %v1437_v3  ;;  %v1581_v56 = vand.u32 2147483648, %v3747_v15 }
 0x215   : > { %v1461_v29 = vand.u32 2147483648, %v3756_v60  ;;  %2402 = vrcp.f32 %v3869_v2  ;;  %v1573_v42 = vmul.f32 %v3842_v10, %v1572_v44  ;;  %v1744_v14 = vadd.f32 %v3235_v8, %v1678_v1 }
 0x216   : > { %v1751_v30 = vadd.f32 %v3238_v18, %v1685_v32  ;;  %v1694_v52 = vmul.f32 %v3159_v39, %v1554_v23  ;;  %v3906_v7 = vadd.f32 %v3749_v27, %v1198_v11  ;;  %v1444_v3 = vand.u32 2147483647, %v3700_v53 }
 0x217   : > { %v3909_v37 = vor.u32 1.1754944e-38, %v1446_v25  ;;  %v1452_v22 = vsub.f32 1.0, %v1451_v36  ;;  %v3911_v50 = vpop.eup %2400  ;;  %v1579_v18 = vand.u32 2147483647, %v3747_v15  ;;  %2239 = vmatmul.msk.f32.gmra.mxu1 %vm4418_vm1, %v1744_v14  ;;  %v1221_v25 = vand.u32 2147483648, %v3840_v33 }
 0x218   : > { %2246 = vmatmul.msk.f32.gmra.mxu2 %vm4418_vm1, %v1751_v30  ;;  %v1760_v11 = vadd.f32 %v3291_v13, %v1694_v52  ;;  %2404 = vrcp.f32 %v3899_v46  ;;  %v3936_v44 = vadd.f32 %v3758_v21, %v1558_v61  ;;  %v3938_v36 = vor.u32 1.1754944e-38, %v1581_v56  ;;  %v3985_v52 = vpop.xlane.xlu1 %1118 }
 0x219   : > { %v1459_v1 = vand.u32 2147483647, %v3756_v60  ;;  %v1211_v13 = vmul.f32 %v3911_v50, %v3840_v33  ;;  %vm1201_vm15 = vweird.f32 %v3749_v27  ;;  %v3953_v61 = vadd.f32 %v3778_v55, %v1438_v34 }
 0x21a   : > { %v3956_v32 = vadd.f32 %v3842_v10, %v1573_v42  ;;  %v3958_v23 = vor.u32 1.1754944e-38, %v1461_v29  ;;  %2255 = vmatmul.msk.f32.gmra.mxu3 %vm4418_vm1, %v1760_v11  ;;  %v1219_v56 = vand.u32 2147483647, %v3840_v33  ;;  %vm1441_vm3 = vweird.f32 %v3778_v55 }
 0x21b   : > { %v3962_v14 = vpop.eup %2402  ;;  %v1453_v17 = vmul.f32 %v3859_v20, %v1452_v22  ;;  %v1188_v34 = vsel %vm3931_vm13, %v3632_v48, %v3820_v6  ;;  %v1323_v29 = vsel %vm3947_vm14, %v3689_v12, %v3862_v57  ;;  %v1428_v42 = vsel %vm3917_vm12, %v3625_v0, %v3803_v47  ;;  %v4538_v6 = vld [vmem:[#allocation11_spill] sm:$0xff] }
 0x21c   : > { %vm1200_vm4 = vweird.f32 %v3630_v31  ;;  %vm1561_vm6 = vweird.f32 %v3758_v21  ;;  %v1212_v22 = vsub.f32 1.0, %v1211_v13  ;;  %v3980_v30 = vor.u32 1.1754944e-38, %v1221_v25  ;;  %v4536_v25 = vld [vmem:[#allocation13_spill] sm:$0xff]  ;;  %v4537_v13 = vld [vmem:[#allocation15_spill] sm:$0xff] }
 0x21d   : > { %v1331_v48 = vmul.f32 %v3962_v14, %v3869_v2  ;;  %vm1440_vm5 = vweird.f32 %v3700_v53  ;;  %v1341_v12 = vand.u32 2147483648, %v3869_v2  ;;  %v1193_v0 = vsel %vm3883_vm2, %v3772_v63, %v1188_v34  ;;  %vm4069_vm13 = vmor %vm1200_vm4, %vm1201_vm15 }
 0x21e   : > { %v1328_v47 = vsel %vm3887_vm10, %v3806_v45, %v1323_v29  ;;  %v1433_v57 = vsel %vm3877_vm11, %v3751_v43, %v1428_v42  ;;  %v3998_v8 = vpop.eup %2404  ;;  %vm1560_vm7 = vweird.f32 %v3645_v19  ;;  %v1194_v16 = vmul.f32 %v4536_v25, %v1193_v0  ;;  %v4032_v0 = vpop.xlane.xlu2 %1046  ;;  %vm4085_vm15 = vmor %vm1440_vm5, %vm1441_vm3 }
 0x21f   : > { %v1332_v11 = vsub.f32 1.0, %v1331_v48  ;;  %v1329_v38 = vmul.f32 %v4537_v13, %v1328_v47  ;;  %v1434_v40 = vmul.f32 %v4538_v6, %v1433_v57  ;;  %v4539_v63 = vand.u32 2147483647, %v3630_v31  ;;  %v4038_v13 = vpop.xlane.xlu0 %1070  ;;  %vm4105_vm3 = vmor %vm1560_vm7, %vm1561_vm6 }
 0x220   : > { %vm4010_vm9 = vcmp.eq.f32.partialorder %v1444_v3, 8.507059e+37  ;;  %v4015_v43 = vadd.f32 %v3859_v20, %v1453_v17  ;;  %v1466_v51 = vmul.f32 %v3998_v8, %v3899_v46  ;;  %v1476_v34 = vand.u32 2147483648, %v3899_v46 }
 0x221   : > { %vm4006_vm8 = vcmp.eq.f32.partialorder %v4539_v63, 8.507059e+37  ;;  %2406 = vrcp.f32 %v3985_v52  ;;  %v4544_v29 = vand.u32 2147483647, %v3645_v19  ;;  %v1213_v3 = vmul.f32 %v3911_v50, %v1212_v22 }
 0x222   : > { %v1670_v17 = vmul.f32 %v3159_v39, %v1194_v16  ;;  %v1679_v48 = vmul.f32 %v3159_v39, %v1329_v38  ;;  %v1686_v6 = vmul.f32 %v3159_v39, %v1434_v40  ;;  %vm1216_vm12 = vweird.f32 %v3911_v50 }
 0x223   : > { %vm4024_vm2 = vcmp.eq.f32.partialorder %v4544_v29, 8.507059e+37  ;;  %v1333_v47 = vmul.f32 %v3962_v14, %v1332_v11  ;;  %v1467_v57 = vsub.f32 1.0, %v1466_v51  ;;  %v1596_v25 = vand.u32 2147483648, %v3985_v52 }
 0x224   : > { %v4040_v22 = vor.u32 1.1754944e-38, %v1341_v12  ;;  %v1736_v16 = vadd.f32 %v3256_v59, %v1670_v17  ;;  %v1745_v38 = vadd.f32 %v3320_v35, %v1679_v48  ;;  %v1594_v40 = vand.u32 2147483647, %v3985_v52 }
 0x225   : > { %vm4047_vm0 = vcmp.eq.f32.partialorder %v1219_v56, 8.507059e+37  ;;  %v1468_v11 = vmul.f32 %v3998_v8, %v1467_v57  ;;  %v1474_v51 = vand.u32 2147483647, %v3899_v46  ;;  %v1752_v12 = vadd.f32 %v3294_v5, %v1686_v6 }
 0x226   : > { %2408 = vrcp.f32 %v4032_v0  ;;  %v1214_v59 = vadd.f32 %v3911_v50, %v1213_v3  ;;  %v4057_v35 = vor.u32 1.1754944e-38, %v1476_v34  ;;  %2231 = vmatmul.msk.f32.gmra.mxu0 %vm4418_vm1, %v1736_v16  ;;  %2240 = vmatmul.msk.f32.gmra.mxu1 %vm4418_vm1, %v1745_v38  ;;  %v1236_v56 = vand.u32 2147483648, %v4032_v0 }
 0x227   : > { %2410 = vrcp.f32 %v4038_v13  ;;  %v4063_v29 = vpop.eup %2406  ;;  %vm1575_vm10 = vweird.f32 %v3747_v15  ;;  %v4075_v34 = vadd.f32 %v3962_v14, %v1333_v47  ;;  %2247 = vmatmul.msk.f32.gmra.mxu2 %vm4418_vm1, %v1752_v12  ;;  %vm1590_vm11 = vweird.f32 %v3985_v52 }
 0x228   : > { %v1597_v3 = vor.u32 1.1754944e-38, %v1596_v25  ;;  %v1234_v17 = vand.u32 2147483647, %v4032_v0  ;;  %v4091_v48 = vadd.f32 %v3998_v8, %v1468_v11  ;;  %v1586_v6 = vmul.f32 %v4063_v29, %v3985_v52 }
 0x229   : > { %vm4095_vm14 = vcmp.eq.f32.partialorder %v1594_v40, 8.507059e+37  ;;  %v1354_v57 = vand.u32 2147483647, %v4038_v13  ;;  %v1356_v53 = vand.u32 2147483648, %v4038_v13  ;;  %vm4111_vm5 = vcmp.eq.f32.partialorder %v1459_v1, 8.507059e+37 }
 0x22a   : > { %vm1591_vm4 = vweird.f32 %v4063_v29  ;;  %v4117_v38 = vor.u32 1.1754944e-38, %v1236_v56  ;;  %v1203_v19 = vsel %vm4069_vm13, %v3749_v27, %v3906_v7  ;;  %v1443_v40 = vsel %vm4085_vm15, %v3778_v55, %v3953_v61  ;;  %v4568_v56 = vld [vmem:[#allocation17_spill] sm:$0xff] }
 0x22b   : > { %vm4129_vm6 = vcmp.eq.f32.partialorder %v1579_v18, 8.507059e+37  ;;  %vm4561_vm7 = vweird.f32 %v3840_v33  ;;  %v1587_v27 = vsub.f32 1.0, %v1586_v6  ;;  %v1208_v55 = vsel %vm4006_vm8, %v3845_v41, %v1203_v19  ;;  %v4571_v19 = vld [vmem:[#allocation16_spill] sm:$0xff]  ;;  %vm1592_vm13 = vmor %vm1590_vm11, %vm1591_vm4 }
 0x22c   : > { %vm4137_vm1 = vmor %vm4561_vm7, %vm1216_vm12  ;;  %v1448_v7 = vsel %vm4010_vm9, %v3909_v37, %v1443_v40  ;;  %v1563_v33 = vsel %vm4105_vm3, %v3758_v21, %v3936_v44  ;;  %v2409_v18 = vpop.eup %2408  ;;  %v4564_v61 = vand.u32 2147483647, %v3869_v2  ;;  %v1209_v41 = vmul.f32 %v4567_v54, %v1208_v55 }
 0x22d   : > { %v1449_v5 = vmul.f32 %v4568_v56, %v1448_v7  ;;  %v1568_v37 = vsel %vm4024_vm2, %v3854_v28, %v1563_v33  ;;  %v1218_v21 = vsel %vm4137_vm1, %v3911_v50, %v1214_v59  ;;  %v2411_v44 = vpop.eup %2410  ;;  %v1588_v45 = vmul.f32 %v4063_v29, %v1587_v27  ;;  %v4580_v33 = vld [vmem:[#allocation19_spill] sm:$0xff]  ;;  %v4597_v56 = vld [vmem:[#allocation20_spill] sm:$0xff] }
 0x22e   : > { %vm4154_vm12 = vcmp.eq.f32.partialorder %v4564_v61, 8.507059e+37  ;;  %v1226_v31 = vmul.f32 %v2409_v18, %v4032_v0  ;;  %vm4169_vm8 = vcmp.eq.f32.partialorder %v1234_v17, 8.507059e+37  ;;  %v1357_v25 = vor.u32 1.1754944e-38, %v1356_v53 }
 0x22f   : > { %v1569_v40 = vmul.f32 %v4571_v19, %v1568_v37  ;;  %vm4174_vm9 = vcmp.eq.f32.partialorder %v1474_v51, 8.507059e+37  ;;  %v4572_v55 = vmov 0  ;;  %v1346_v28 = vmul.f32 %v2411_v44, %v4038_v13  ;;  %v4602_v37 = vld [vmem:[#allocation23_spill] sm:$0xff]  ;;  %v4614_v51 = vld [vmem:[#allocation34_spill] sm:$0xff] }
 0x230   : > { %v4573_v55 = vsel %vm4174_vm9, 4294967295, %v4572_v55  ;;  %vm4179_vm1 = vcmp.eq.f32.partialorder %v1354_v57, 8.507059e+37  ;;  %v1671_v42 = vmul.f32 %v3159_v39, %v1209_v41  ;;  %v1687_v59 = vmul.f32 %v3159_v39, %v1449_v5 }
 0x231   : > { %vm4576_vm3 = vweird.f32 %v3859_v20  ;;  %vm4577_vm7 = vweird.f32 %v3756_v60  ;;  %v1589_v17 = vadd.f32 %v4063_v29, %v1588_v45  ;;  %v1227_v53 = vsub.f32 1.0, %v1226_v31  ;;  %v4604_v45 = vld [vmem:[#allocation25_spill] sm:$0xff] }
 0x232   : > { %vm4189_vm15 = vmor %vm4577_vm7, %vm4576_vm3  ;;  %v1695_v57 = vmul.f32 %v3159_v39, %v1569_v40  ;;  %v1223_v11 = vsel %vm4047_vm0, %v3980_v30, %v1218_v21  ;;  %v1347_v27 = vsub.f32 1.0, %v1346_v28  ;;  %v1737_v60 = vadd.f32 %v3313_v49, %v1671_v42  ;;  %v4603_v21 = vld [vmem:[#allocation22_spill] sm:$0xff]  ;;  %v4608_v28 = vld [vmem:[#allocation24_spill] sm:$0xff] }
 0x233   : > { %v1753_v7 = vadd.f32 %v3341_v62, %v1687_v59  ;;  %v1224_v61 = vmul.f32 %v4580_v33, %v1223_v11  ;;  %vm4581_vm3 = vweird.f32 %v3842_v10  ;;  %v1593_v30 = vsel %vm1592_vm13, %v4063_v29, %v1589_v17  ;;  %v4615_v17 = vld [vmem:[#allocation26_spill] sm:$0xff] }
 0x234   : > { %vm4209_vm7 = vmor %vm1575_vm10, %vm4581_vm3  ;;  %v1228_v63 = vmul.f32 %v2409_v18, %v1227_v53  ;;  %v1761_v52 = vadd.f32 %v3345_v24, %v1695_v57  ;;  %v1458_v49 = vsel %vm4189_vm15, %v3859_v20, %v4015_v43  ;;  %vm4584_vm0 = vweird.f32 %v3962_v14  ;;  %v4616_v57 = vld [vmem:[#allocation33_spill] sm:$0xff] }
 0x235   : > { %vm4585_vm11 = vweird.f32 %v3869_v2  ;;  %v1598_v15 = vsel %vm4095_vm14, %v1597_v3, %v1593_v30  ;;  %v1348_v29 = vmul.f32 %v2411_v44, %v1347_v27  ;;  %vm1351_vm10 = vweird.f32 %v2411_v44 }
 0x236   : > { %vm4223_vm4 = vmor %vm4585_vm11, %vm4584_vm0  ;;  %vm4588_vm13 = vcmask 523264   ;;  %v1672_v24 = vmul.f32 %v3159_v39, %v1224_v61  ;;  %vm4590_vm15 = vweird.f32 %v3998_v8  ;;  %vm4591_vm2 = vweird.f32 %v3899_v46 }
 0x237   : > { %2232 = vmatmul.msk.f32.gmra.mxu0 %vm4588_vm13, %v1737_v60  ;;  %vm4589_vm3 = vmmov %vm4588_vm13  ;;  %v1229_v2 = vadd.f32 %v2409_v18, %v1228_v63  ;;  %v1463_v43 = vsel %vm4111_vm5, %v3958_v23, %v1458_v49  ;;  %v1578_v3 = vsel %vm4209_vm7, %v3842_v10, %v3956_v32  ;;  %v1338_v46 = vsel %vm4223_vm4, %v3962_v14, %v4075_v34  ;;  %v4599_v10 = vld [vmem:[#allocation18_spill] sm:$0xff] }
 0x238   : > { %2248 = vmatmul.msk.f32.gmra.mxu2 %vm4589_vm3, %v1753_v7  ;;  %vm4236_vm9 = vmor %vm4591_vm2, %vm4590_vm15  ;;  %vm4595_vm14 = vweird.f32 %v2409_v18  ;;  %vm4596_vm2 = vweird.f32 %v4032_v0  ;;  %v1349_v47 = vadd.f32 %v2411_v44, %v1348_v29  ;;  %v1738_v41 = vadd.f32 %v3356_v4, %v1672_v24 }
 0x239   : > { %vm4594_vm0 = vmmov %vm4589_vm3  ;;  %v1464_v16 = vmul.f32 %v4597_v56, %v1463_v43  ;;  %v1583_v23 = vsel %vm4129_vm6, %v3938_v36, %v1578_v3  ;;  %vm4598_vm5 = vweird.f32 %v4038_v13  ;;  %v1343_v14 = vsel %vm4154_vm12, %v4040_v22, %v1338_v46  ;;  %v4600_v13 = vld [vmem:[#allocation21_spill] sm:$0xff] }
 0x23a   : > { %2256 = vmatmul.msk.f32.gmra.mxu3 %vm4594_vm0, %v1761_v52  ;;  %vm1232_vm11 = vmor %vm4596_vm2, %vm4595_vm14  ;;  %v1584_v32 = vmul.f32 %v4599_v10, %v1583_v23  ;;  %v1473_v4 = vsel %vm4236_vm9, %v3998_v8, %v4091_v48  ;;  %v1344_v1 = vmul.f32 %v4600_v13, %v1343_v14  ;;  %vm4601_vm6 = vnez %v4573_v55  ;;  %v4607_v55 = vld [vmem:[#allocation35_spill] sm:$0xff] }
 0x23b   : > { %v1233_v5 = vsel %vm1232_vm11, %v2409_v18, %v1229_v2  ;;  %vm1352_vm7 = vmor %vm4598_vm5, %vm1351_vm10  ;;  %v1688_v34 = vmul.f32 %v3159_v39, %v1464_v16  ;;  %v1478_v22 = vsel %vm4601_vm6, %v4057_v35, %v1473_v4  ;;  %v1599_v8 = vmul.f32 %v4602_v37, %v1598_v15 }
 0x23c   : > { %v1238_v36 = vsel %vm4169_vm8, %v4117_v38, %v1233_v5  ;;  %v1353_v0 = vsel %vm1352_vm7, %v2411_v44, %v1349_v47  ;;  %v1696_v12 = vmul.f32 %v3159_v39, %v1584_v32  ;;  %v1680_v38 = vmul.f32 %v3159_v39, %v1344_v1  ;;  %vm4609_vm12 = vmmov %vm4594_vm0 }
 0x23d   : > { %v1358_v18 = vsel %vm4179_vm1, %v1357_v25, %v1353_v0  ;;  %v1754_v48 = vadd.f32 %v3359_v26, %v1688_v34  ;;  %v1479_v44 = vmul.f32 %v4603_v21, %v1478_v22  ;;  %v1239_v31 = vmul.f32 %v4604_v45, %v1238_v36  ;;  %vm4610_vm8 = vmmov %vm4594_vm0  ;;  %v4611_v26 = vld [vmem:[#allocation36_spill] sm:$0xff] }
 0x23e   : > { %v4605_v6 = vmax.f32 %v2857_v58, 0.0  ;;  %v4606_v19 = vmax.f32 %v2870_v9, 0.0  ;;  %v1762_v35 = vadd.f32 %v4607_v55, %v1696_v12  ;;  %v1359_v50 = vmul.f32 %v4608_v28, %v1358_v18  ;;  %vm4612_vm9 = vmmov %vm4594_vm0 }
 0x23f   : > { %2233 = vmatmul.msk.f32.gmra.mxu0 %vm4609_vm12, %v1738_v41  ;;  %v1746_v42 = vadd.f32 %v4611_v26, %v1680_v38  ;;  %v1689_v59 = vmul.f32 %v3159_v39, %v1479_v44  ;;  %v1673_v58 = vmul.f32 %v3159_v39, %v1239_v31  ;;  %v1697_v9 = vmul.f32 %v3159_v39, %v1599_v8  ;;  %vm4613_vm1 = vmmov %vm4594_vm0 }
 0x240   : > { %v1647_v25 = vmul.f32 %v4605_v6, %v4605_v6  ;;  %v1663_v40 = vmul.f32 %v4606_v19, %v4606_v19  ;;  %2249 = vmatmul.msk.f32.gmra.mxu2 %vm4610_vm8, %v1754_v48  ;;  %v1723_v53 = vmul.f32 %v4615_v17, %v4614_v51  ;;  %v1707_v11 = vmul.f32 %v4615_v17, %v4616_v57  ;;  %vm4617_vm4 = vmmov %vm4594_vm0 }
 0x241   : > { %2241 = vmatmul.msk.f32.gmra.mxu1 %vm4613_vm1, %v1746_v42  ;;  %v1681_v27 = vmul.f32 %v3159_v39, %v1359_v50  ;;  %vm4618_vm10 = vmmov %vm4594_vm0  ;;  %v1805_v39 = vpop.f32.mrf.mxu0  ;;  %vm4621_vm15 = vcmask 64512  }
 0x242   : > { %2257 = vmatmul.msk.f32.gmra.mxu3 %vm4612_vm9, %v1762_v35  ;;  %v1731_v60 = vmul.f32 %v4615_v17, %v1663_v40  ;;  %v1755_v7 = vadd.f32 %v1723_v53, %v1689_v59  ;;  %v1739_v33 = vadd.f32 %v1707_v11, %v1673_v58  ;;  %v1715_v61 = vmul.f32 %v4615_v17, %v1647_v25  ;;  %vm4619_vm13 = vmmov %vm4594_vm0 }
 0x243   : > { %vm4620_vm3 = vmmov %vm4594_vm0  ;;  %2024 = vst.msk [vmem:[%s4318_s9] sm:$0xff] %vm4621_vm15, %v1805_v39 }
 0x244   : > { %v1763_v54 = vadd.f32 %v1731_v60, %v1697_v9  ;;  %v1747_v30 = vadd.f32 %v1715_v61, %v1681_v27  ;;  %vm4622_vm0 = vmmov %vm4621_vm15 }
 0x245   : > { %vm4623_vm14 = vmmov %vm4622_vm0 }
 0x246   : > { %vm4624_vm2 = vmmov %vm4622_vm0 }
 0x247   : > { %2234 = vmatmul.msk.f32.gmra.mxu0 %vm4618_vm10, %v1739_v33  ;;  %vm4625_vm11 = vmmov %vm4622_vm0 }
 0x248   : > { %2250 = vmatmul.msk.f32.gmra.mxu2 %vm4617_vm4, %v1755_v7  ;;  %vm4626_vm5 = vmmov %vm4622_vm0 }
 0x249   : > { %2242 = vmatmul.msk.f32.gmra.mxu1 %vm4620_vm3, %v1747_v30  ;;  %vm4627_vm7 = vmmov %vm4622_vm0 }
 0x24a   : > { %2258 = vmatmul.msk.f32.gmra.mxu3 %vm4619_vm13, %v1763_v54  ;;  %vm4628_vm6 = vmmov %vm4622_vm0 }
 0x24b   : > { %vm4629_vm12 = vmmov %vm4622_vm0 }
 0x24c   : > { %v1870_v63 = vpop.f32.mrf.mxu1  ;;  %vm4630_vm8 = vmmov %vm4622_vm0 }
 0x24d   : > { %2032 = vst.msk [vmem:[%s4318_s9 + $0x40] sm:$0xff] %vm4622_vm0, %v1870_v63  ;;  %vm4631_vm9 = vmmov %vm4622_vm0 }
 0x24e   : > { %vm4632_vm1 = vmmov %vm4622_vm0 }
 0x24f   : > { %vm4633_vm4 = vmmov %vm4622_vm0 }
 0x250   : > { %vm4634_vm10 = vmmov %vm4622_vm0 }
 0x251   : > { %vm4635_vm13 = vmmov %vm4622_vm0 }
 0x252   : > { %v1935_v52 = vpop.f32.mrf.mxu2  ;;  %vm4636_vm3 = vmmov %vm4622_vm0 }
 0x253   : > { %2040 = vst.msk [vmem:[%s4318_s9 + $0x80] sm:$0xff] %vm4623_vm14, %v1935_v52  ;;  %vm4637_vm15 = vmmov %vm4622_vm0 }
 0x254   : > { %vm4638_vm14 = vmmov %vm4622_vm0 }
 0x25c   : > { %v1808_v49 = vpop.f32.mrf.mxu0 }
 0x25d   : > { %2025 = vst.msk [vmem:[%s4318_s9 + $0x8] sm:$0xff] %vm4624_vm2, %v1808_v49  ;;  %v2000_v62 = vpop.f32.mrf.mxu3  ;;  %vm4639_vm2 = vmmov %vm4622_vm0 }
 0x25e   : > { %2048 = vst.msk [vmem:[%s4318_s9 + $0xc0] sm:$0xff] %vm4625_vm11, %v2000_v62  ;;  %vm4640_vm11 = vmmov %vm4622_vm0 }
 0x261   : > { %v1938_v15 = vpop.f32.mrf.mxu2 }
 0x262   : > { %2041 = vst.msk [vmem:[%s4318_s9 + $0x88] sm:$0xff] %vm4626_vm5, %v1938_v15  ;;  %vm4641_vm5 = vmmov %vm4622_vm0 }
 0x266   : > { %v1873_v29 = vpop.f32.mrf.mxu1 }
 0x267   : > { %2033 = vst.msk [vmem:[%s4318_s9 + $0x48] sm:$0xff] %vm4627_vm7, %v1873_v29  ;;  %vm4642_vm7 = vmmov %vm4622_vm0 }
 0x270   : > { %v1811_v24 = vpop.f32.mrf.mxu0 }
 0x271   : > { %2026 = vst.msk [vmem:[%s4318_s9 + $0x10] sm:$0xff] %vm4628_vm6, %v1811_v24  ;;  %v2003_v20 = vpop.f32.mrf.mxu3  ;;  %vm4643_vm6 = vmmov %vm4622_vm0 }
 0x272   : > { %2049 = vst.msk [vmem:[%s4318_s9 + $0xc8] sm:$0xff] %vm4629_vm12, %v2003_v20  ;;  %vm4644_vm12 = vmmov %vm4622_vm0 }
 0x276   : > { %v1876_v2 = vpop.f32.mrf.mxu1 }
 0x277   : > { %2034 = vst.msk [vmem:[%s4318_s9 + $0x50] sm:$0xff] %vm4630_vm8, %v1876_v2  ;;  %vm4645_vm8 = vmmov %vm4622_vm0 }
 0x27f   : > { %v1941_v43 = vpop.f32.mrf.mxu2 }
 0x280   : > { %v2006_v3 = vpop.f32.mrf.mxu3  ;;  %2042 = vst.msk [vmem:[%s4318_s9 + $0x90] sm:$0xff] %vm4631_vm9, %v1941_v43  ;;  %vm4646_vm9 = vmmov %vm4622_vm0 }
 0x281   : > { %2050 = vst.msk [vmem:[%s4318_s9 + $0xd0] sm:$0xff] %vm4632_vm1, %v2006_v3  ;;  %vm4647_vm1 = vmmov %vm4622_vm0 }
 0x286   : > { %v1814_v46 = vpop.f32.mrf.mxu0  ;;  %v1879_v47 = vpop.f32.mrf.mxu1 }
 0x287   : > { %2027 = vst.msk [vmem:[%s4318_s9 + $0x18] sm:$0xff] %vm4633_vm4, %v1814_v46  ;;  %vm4648_vm4 = vmmov %vm4622_vm0 }
 0x288   : > { %2035 = vst.msk [vmem:[%s4318_s9 + $0x58] sm:$0xff] %vm4634_vm10, %v1879_v47  ;;  %vm4649_vm10 = vmmov %vm4622_vm0 }
 0x28e   : > { %v2009_v41 = vpop.f32.mrf.mxu3 }
 0x28f   : > { %2051 = vst.msk [vmem:[%s4318_s9 + $0xd8] sm:$0xff] %vm4635_vm13, %v2009_v41  ;;  %vm4650_vm13 = vmmov %vm4622_vm0 }
 0x294   : > { %v1882_v56 = vpop.f32.mrf.mxu1 }
 0x295   : > { %2036 = vst.msk [vmem:[%s4318_s9 + $0x60] sm:$0xff] %vm4636_vm3, %v1882_v56  ;;  %vm4651_vm3 = vmmov %vm4622_vm0 }
 0x29b   : > { %v1944_v16 = vpop.f32.mrf.mxu2 }
 0x29c   : > { %2043 = vst.msk [vmem:[%s4318_s9 + $0x98] sm:$0xff] %vm4637_vm15, %v1944_v16 }
 0x29d   : > { %v2012_v23 = vpop.f32.mrf.mxu3 }
 0x29e   : > { %2052 = vst.msk [vmem:[%s4318_s9 + $0xe0] sm:$0xff] %vm4622_vm0, %v2012_v23 }
 0x2a3   : > { %v1817_v5 = vpop.f32.mrf.mxu0  ;;  %v1885_v10 = vpop.f32.mrf.mxu1 }
 0x2a4   : > { %2028 = vst.msk [vmem:[%s4318_s9 + $0x20] sm:$0xff] %vm4638_vm14, %v1817_v5 }
 0x2a5   : > { %2037 = vst.msk [vmem:[%s4318_s9 + $0x68] sm:$0xff] %vm4639_vm2, %v1885_v10 }
 0x2aa   : > { %v1947_v32 = vpop.f32.mrf.mxu2 }
 0x2ab   : > { %2044 = vst.msk [vmem:[%s4318_s9 + $0xa0] sm:$0xff] %vm4640_vm11, %v1947_v32 }
 0x2b4   : > { %v1820_v14 = vpop.f32.mrf.mxu0 }
 0x2b5   : > { %2029 = vst.msk [vmem:[%s4318_s9 + $0x28] sm:$0xff] %vm4641_vm5, %v1820_v14 }
 0x2bb   : > { %v1950_v4 = vpop.f32.mrf.mxu2 }
 0x2bc   : > { %2045 = vst.msk [vmem:[%s4318_s9 + $0xa8] sm:$0xff] %vm4642_vm7, %v1950_v4  ;;  %v1823_v0 = vpop.f32.mrf.mxu0 }
 0x2bd   : > { %v2015_v36 = vpop.f32.mrf.mxu3  ;;  %2030 = vst.msk [vmem:[%s4318_s9 + $0x30] sm:$0xff] %vm4644_vm12, %v1823_v0 }
 0x2be   : > { %2053 = vst.msk [vmem:[%s4318_s9 + $0xe8] sm:$0xff] %vm4643_vm6, %v2015_v36  ;;  %v1888_v34 = vpop.f32.mrf.mxu1 }
 0x2bf   : > { %2038 = vst.msk [vmem:[%s4318_s9 + $0x70] sm:$0xff] %vm4645_vm8, %v1888_v34 }
 0x2c3   : > { %v1953_v13 = vpop.f32.mrf.mxu2 }
 0x2c4   : > { %2046 = vst.msk [vmem:[%s4318_s9 + $0xb0] sm:$0xff] %vm4646_vm9, %v1953_v13  ;;  %v1826_v18 = vpop.f32.mrf.mxu0 }
 0x2c5   : > { %v2018_v1 = vpop.f32.mrf.mxu3  ;;  %2031 = vst.msk [vmem:[%s4318_s9 + $0x38] sm:$0xff] %vm4648_vm4, %v1826_v18 }
 0x2c6   : > { %2054 = vst.msk [vmem:[%s4318_s9 + $0xf0] sm:$0xff] %vm4647_vm1, %v2018_v1  ;;  %v1891_v12 = vpop.f32.mrf.mxu1 }
 0x2c7   : > { %2039 = vst.msk [vmem:[%s4318_s9 + $0x78] sm:$0xff] %vm4649_vm10, %v1891_v12 }
 0x2cb   : > { %v1956_v22 = vpop.f32.mrf.mxu2 }
 0x2cc   : > { %2047 = vst.msk [vmem:[%s4318_s9 + $0xb8] sm:$0xff] %vm4650_vm13, %v1956_v22 }
 0x2cd   : > { %v2021_v37 = vpop.f32.mrf.mxu3 }
 0x2ce   : > { %2055 = vst.msk [vmem:[%s4318_s9 + $0xf8] sm:$0xff] %vm4651_vm3, %v2021_v37 }
 0x2cf PF: > { %s17_s21 = sadd.s32 1, %s2437_s21  }
 0x2d0   : > { %p14_p7 = scmp.ge.s32.totalorder %s17_s21, 10  }
 0x2d2   :  { %16 = sbr.rel (!%p14_p7) target bundleno = 1 (0x1), region = 85 }
 0x2d7   :  { %2077 = vsyncpa [#allocation3], 1 }
 0x2d8   :  { %2079 = vsyncpa [#allocation3 + $0x1], 1 }

</bundles_post_ra>
